<compile_context>
chip_gen: v5e
topology: v5e:2x2
jax: 0.10.0
libtpu: 0.0.40
codegen_flags: <defaults>
</compile_context>

<pallas_src>
import functools

import jax
import jax.numpy as jnp
from jax.experimental import pallas as pl
from jax.experimental.pallas import tpu as pltpu

# ---------------- small synthetic config (real BERT: H=768, 12 layers) -------
B, S, H = 2, 8, 32
NUM_HEADS = 4
HEAD_DIM = H // NUM_HEADS
NUM_LAYERS = 2
INTERMEDIATE = 64
VOCAB = 64
MAX_POS = 16
TYPE_VOCAB = 2
NUM_LABELS = 2
ALPHA_INIT = 0.5
LN_EPS = 1e-12
LANE_PAD = 128          # lane-dense classifier output width
SUB_PAD = 8             # sublane-dense classifier output height


# ---------------------------- in-kernel helpers ------------------------------

def _ln(x, gamma, beta, eps):
    mu = jnp.mean(x, axis=-1, keepdims=True)
    xc = x - mu
    var = jnp.mean(xc * xc, axis=-1, keepdims=True)
    return (xc * jax.lax.rsqrt(var + eps)) * gamma + beta


def _gelu_tanh(x):
    # TODO(synk): HuggingFace BERT default "gelu" is the exact erf form; tanh approx used
    # here (exact erf is not guaranteed to lower in Mosaic).
    return 0.5 * x * (1.0 + jnp.tanh(0.7978845608028654 * (x + 0.044715 * x * x * x)))


# ------------------------------ fused kernel --------------------------------

def _bert_kernel(emb_ref, mask_ref, emb_g_ref, emb_b_ref,
                 qkv_w_ref, qkv_b_ref, ao_w_ref, ao_b_ref,
                 ln1_g_ref, ln1_b_ref, fi_w_ref, fi_b_ref,
                 fo_w_ref, fo_b_ref, ln2_g_ref, ln2_b_ref,
                 pool_w_ref, pool_b_ref, cls_w_ref, cls_b_ref,
                 emb_out_ref, layer_out_ref, logits_ref,
                 x_sc,
                 *, seq, num_heads, head_dim, eps):
    """Whole BERTCombine forward for one batch element; grid axis 1 iterates layers."""
    hidden = num_heads * head_dim
    scale = 1.0 / (float(head_dim) ** 0.5)
    layer = pl.program_id(1)

    # ---- l == 0: embedding LayerNorm (no-residual), seed the resident activation ----
    @pl.when(layer == 0)
    def _():
        e = _ln(emb_ref[...], emb_g_ref[...], emb_b_ref[...], eps)
        x_sc[...] = e
        emb_out_ref[...] = e
        # embedding dropout: identity at inference

    x = x_sc[...]                                  # (S, H) f32, resident across layers
    x_bf = x.astype(jnp.bfloat16)

    # ---- fused QKV projection: one bf16 MXU pass with N = 3H, f32 accumulate ----
    qkv = (jnp.dot(x_bf, qkv_w_ref[...], preferred_element_type=jnp.float32)
           + qkv_b_ref[...])                       # (S, 3H) f32
    q_all = qkv[:, :hidden]                        # (S, H)
    kT_all = qkv[:, hidden:2 * hidden].T           # (H, S)  single f32 2-D transpose
    v_all = qkv[:, 2 * hidden:]                    # (S, H)

    # Hoisted additive key mask: broadcast once, reused by every head.
    mask_qk = jnp.broadcast_to(mask_ref[...], (seq, seq))      # (S, S) f32

    # ---- self-attention: per-head 2-D matmuls (static unroll), f32 softmax ----
    ctx_parts = []
    for h in range(num_heads):
        lo = h * head_dim
        q_h = q_all[:, lo:lo + head_dim].astype(jnp.bfloat16)        # (S, d)
        kT_h = kT_all[lo:lo + head_dim, :].astype(jnp.bfloat16)      # (d, S)
        v_h = v_all[:, lo:lo + head_dim].astype(jnp.bfloat16)        # (S, d)
        s = (jnp.dot(q_h, kT_h, preferred_element_type=jnp.float32) * scale
             + mask_qk)                                              # (S, S) f32
        s = s - jnp.max(s, axis=-1, keepdims=True)
        p = jnp.exp(s)
        p = p * pl.reciprocal(jnp.sum(p, axis=-1, keepdims=True), approx=True)
        ctx_parts.append(jnp.dot(p.astype(jnp.bfloat16), v_h,
                                 preferred_element_type=jnp.float32))  # (S, d)
    ctx = jnp.concatenate(ctx_parts, axis=1).astype(jnp.bfloat16)      # (S, H)

    # ---- single output-projection matmul (K = H), residual + LayerNorm 1 ----
    attn = (jnp.dot(ctx, ao_w_ref[...], preferred_element_type=jnp.float32)
            + ao_b_ref[...])
    x1 = _ln(attn + x, ln1_g_ref[...], ln1_b_ref[...], eps)

    # ---- feed-forward (gelu) + residual + LayerNorm 2 ----
    ff = _gelu_tanh(jnp.dot(x1.astype(jnp.bfloat16), fi_w_ref[...],
                            preferred_element_type=jnp.float32) + fi_b_ref[...])
    y = (jnp.dot(ff.astype(jnp.bfloat16), fo_w_ref[...],
                 preferred_element_type=jnp.float32) + fo_b_ref[...])
    y = _ln(y + x1, ln2_g_ref[...], ln2_b_ref[...], eps)

    x_sc[...] = y
    layer_out_ref[...] = y

    # ---- last layer: fused pooler (tanh on [CLS]) + classifier, lane-dense output ----
    @pl.when(layer == pl.num_programs(1) - 1)
    def _():
        pooled = jnp.tanh(jnp.dot(y[0:1, :].astype(jnp.bfloat16), pool_w_ref[...],
                                  preferred_element_type=jnp.float32) + pool_b_ref[...])
        # pooled = self.dropout(pooled): identity at inference
        logits = (jnp.dot(pooled.astype(jnp.bfloat16), cls_w_ref[...],
                          preferred_element_type=jnp.float32) + cls_b_ref[...])  # (1, 128)
        logits_ref[...] = jnp.broadcast_to(logits, logits_ref.shape)


def bert_combine_forward(params, input_ids, attention_mask, token_type_ids):
    """Returns (logits, hidden_states) — the labels=None path of BERTCombine.forward."""
    # Embedding gathers stay in plain JAX (table lookup has no useful Pallas form here).
    positions = jnp.arange(S)
    emb = (params["word_emb"][input_ids]
           + params["pos_emb"][positions][None, :, :]
           + params["type_emb"][token_type_ids])                       # (B, S, H) f32
    mask_add = ((1.0 - attention_mask.astype(jnp.float32)) * -10000.0
                ).reshape(B, 1, S)                                     # additive key mask

    kernel = functools.partial(_bert_kernel, seq=S, num_heads=NUM_HEADS,
                               head_dim=HEAD_DIM, eps=LN_EPS)

    grid_spec = pltpu.PrefetchScalarGridSpec(
        num_scalar_prefetch=0,
        grid=(B, NUM_LAYERS),
        in_specs=[
            pl.BlockSpec((None, S, H), lambda b, l: (b, 0, 0)),            # emb
            pl.BlockSpec((None, 1, S), lambda b, l: (b, 0, 0)),            # mask
            pl.BlockSpec((1, H), lambda b, l: (0, 0)),                     # emb_ln_g
            pl.BlockSpec((1, H), lambda b, l: (0, 0)),                     # emb_ln_b
            pl.BlockSpec((None, H, 3 * H), lambda b, l: (l, 0, 0)),        # qkv_w
            pl.BlockSpec((None, 1, 3 * H), lambda b, l: (l, 0, 0)),        # qkv_b
            pl.BlockSpec((None, H, H), lambda b, l: (l, 0, 0)),            # ao_w
            pl.BlockSpec((None, 1, H), lambda b, l: (l, 0, 0)),            # ao_b
            pl.BlockSpec((None, 1, H), lambda b, l: (l, 0, 0)),            # ln1_g
            pl.BlockSpec((None, 1, H), lambda b, l: (l, 0, 0)),            # ln1_b
            pl.BlockSpec((None, H, INTERMEDIATE), lambda b, l: (l, 0, 0)),  # fi_w
            pl.BlockSpec((None, 1, INTERMEDIATE), lambda b, l: (l, 0, 0)),  # fi_b
            pl.BlockSpec((None, INTERMEDIATE, H), lambda b, l: (l, 0, 0)),  # fo_w
            pl.BlockSpec((None, 1, H), lambda b, l: (l, 0, 0)),            # fo_b
            pl.BlockSpec((None, 1, H), lambda b, l: (l, 0, 0)),            # ln2_g
            pl.BlockSpec((None, 1, H), lambda b, l: (l, 0, 0)),            # ln2_b
            pl.BlockSpec((H, H), lambda b, l: (0, 0)),                     # pool_w
            pl.BlockSpec((1, H), lambda b, l: (0, 0)),                     # pool_b
            pl.BlockSpec((H, LANE_PAD), lambda b, l: (0, 0)),              # cls_w (padded)
            pl.BlockSpec((1, LANE_PAD), lambda b, l: (0, 0)),              # cls_b (padded)
        ],
        out_specs=[
            pl.BlockSpec((None, S, H), lambda b, l: (b, 0, 0)),            # emb LN out
            pl.BlockSpec((None, None, S, H), lambda b, l: (l, b, 0, 0)),   # per-layer out
            pl.BlockSpec((None, SUB_PAD, LANE_PAD), lambda b, l: (b, 0, 0)),  # logits
        ],
        scratch_shapes=[pltpu.VMEM((S, H), jnp.float32)],                  # resident x
    )

    emb_out, layer_out, logits_pad = pl.pallas_call(
        kernel,
        out_shape=(
            jax.ShapeDtypeStruct((B, S, H), jnp.float32),
            jax.ShapeDtypeStruct((NUM_LAYERS, B, S, H), jnp.float32),
            jax.ShapeDtypeStruct((B, SUB_PAD, LANE_PAD), jnp.float32),
        ),
        grid_spec=grid_spec,
        compiler_params=pltpu.CompilerParams(
            dimension_semantics=("parallel", "arbitrary"),
            vmem_limit_bytes=32 * 1024 * 1024,
        ),
    )(emb, mask_add, params["emb_ln_g"], params["emb_ln_b"],
      params["qkv_w"], params["qkv_b"], params["ao_w"], params["ao_b"],
      params["ln1_g"], params["ln1_b"], params["fi_w"], params["fi_b"],
      params["fo_w"], params["fo_b"], params["ln2_g"], params["ln2_b"],
      params["pool_w"], params["pool_b"], params["cls_w"], params["cls_b"])

    logits = logits_pad[:, 0, :NUM_LABELS]                       # un-pad lane-dense block
    hidden_states = (emb_out,) + tuple(layer_out[l] for l in range(NUM_LAYERS))
    # TODO(synk): labels path (CrossEntropyLoss) omitted — labels=None here.
    return logits, hidden_states


# ------------------------------ init (plain JAX) -----------------------------

def init_params(key):
    keys = iter(jax.random.split(key, 4096))
    nk = lambda: next(keys)

    def normal(shape, std=0.02):
        return std * jax.random.normal(nk(), shape, dtype=jnp.float32)

    def combine(a, b):
        # combine module: alpha * original + (1 - alpha) * finetuned (affine in params)
        return ALPHA_INIT * a + (1.0 - ALPHA_INIT) * b

    def comb_linear(fan_in, fan_out):
        w = combine(normal((fan_in, fan_out)), normal((fan_in, fan_out)))
        b = combine(normal((1, fan_out)), normal((1, fan_out)))
        return w, b

    def comb_ln():
        g = combine(1.0 + normal((1, H)), 1.0 + normal((1, H)))
        b = combine(normal((1, H)), normal((1, H)))
        return g, b

    p = {
        # embeddings: kept from the original network only (see make_model)
        "word_emb": normal((VOCAB, H)),
        "pos_emb": normal((MAX_POS, H)),
        "type_emb": normal((TYPE_VOCAB, H)),
    }
    p["emb_ln_g"], p["emb_ln_b"] = comb_ln()

    names = ["qkv_w", "qkv_b", "ao_w", "ao_b", "ln1_g", "ln1_b",
             "fi_w", "fi_b", "fo_w", "fo_b", "ln2_g", "ln2_b"]
    per_layer = {n: [] for n in names}
    for _ in range(NUM_LAYERS):
        qw, qb = comb_linear(H, H)
        kw, kb = comb_linear(H, H)
        vw, vb = comb_linear(H, H)
        per_layer["qkv_w"].append(jnp.concatenate([qw, kw, vw], axis=1))   # (H, 3H)
        per_layer["qkv_b"].append(jnp.concatenate([qb, kb, vb], axis=1))   # (1, 3H)
        aw, ab = comb_linear(H, H)
        per_layer["ao_w"].append(aw); per_layer["ao_b"].append(ab)
        g1, b1 = comb_ln(); per_layer["ln1_g"].append(g1); per_layer["ln1_b"].append(b1)
        fw, fb = comb_linear(H, INTERMEDIATE)
        per_layer["fi_w"].append(fw); per_layer["fi_b"].append(fb)
        ow, ob = comb_linear(INTERMEDIATE, H)
        per_layer["fo_w"].append(ow); per_layer["fo_b"].append(ob)
        g2, b2 = comb_ln(); per_layer["ln2_g"].append(g2); per_layer["ln2_b"].append(b2)
    for n, vals in per_layer.items():
        stacked = jnp.stack(vals, axis=0)            # leading layer axis for index_map
        if n.endswith("_w"):
            stacked = stacked.astype(jnp.bfloat16)   # bf16 MXU operands, f32 accumulate
        p[n] = stacked

    pool_w, pool_b = comb_linear(H, H)
    p["pool_w"] = pool_w.astype(jnp.bfloat16)
    p["pool_b"] = pool_b
    # classifier: deepcopy of finetuned classifier (no combine), Linear(H, NUM_LABELS),
    # lane-padded to 128 so the kernel emits an unmasked, lane-dense store.
    cls_w = normal((H, NUM_LABELS))
    cls_b = normal((1, NUM_LABELS))
    p["cls_w"] = (jnp.zeros((H, LANE_PAD), jnp.float32)
                  .at[:, :NUM_LABELS].set(cls_w)).astype(jnp.bfloat16)
    p["cls_b"] = jnp.zeros((1, LANE_PAD), jnp.float32).at[:, :NUM_LABELS].set(cls_b)
    return p


if __name__ == "__main__":
    key = jax.random.PRNGKey(0)
    pkey, ikey = jax.random.split(key)
    params = init_params(pkey)

    input_ids = jax.random.randint(ikey, (B, S), 0, VOCAB, dtype=jnp.int32)
    attention_mask = jnp.ones((B, S), dtype=jnp.int32).at[1, 6:].set(0)
    token_type_ids = jnp.zeros((B, S), dtype=jnp.int32)

    fwd = jax.jit(bert_combine_forward)
    logits, hidden_states = fwd(params, input_ids, attention_mask, token_type_ids)
    jax.block_until_ready(logits)
    jax.block_until_ready(hidden_states)

    assert logits.shape == (B, NUM_LABELS)
    assert len(hidden_states) == NUM_LAYERS + 1
    assert all(h.shape == (B, S, H) for h in hidden_states)
    assert bool(jnp.all(jnp.isfinite(logits)))
    assert all(bool(jnp.all(jnp.isfinite(h))) for h in hidden_states)
    print("KERNEL_OK")
</pallas_src>

<mosaic_0001>
module attributes {stable_mosaic.version = 11 : i64} {
  func.func @_bert_kernel(%arg0: i32, %arg1: i32, %arg2: memref<1x8x32xf32, #tpu.memory_space<vmem>>, %arg3: memref<1x1x8xf32, #tpu.memory_space<vmem>>, %arg4: memref<1x32xf32, #tpu.memory_space<vmem>>, %arg5: memref<1x32xf32, #tpu.memory_space<vmem>>, %arg6: memref<1x32x96xbf16, #tpu.memory_space<vmem>>, %arg7: memref<1x1x96xf32, #tpu.memory_space<vmem>>, %arg8: memref<1x32x32xbf16, #tpu.memory_space<vmem>>, %arg9: memref<1x1x32xf32, #tpu.memory_space<vmem>>, %arg10: memref<1x1x32xf32, #tpu.memory_space<vmem>>, %arg11: memref<1x1x32xf32, #tpu.memory_space<vmem>>, %arg12: memref<1x32x64xbf16, #tpu.memory_space<vmem>>, %arg13: memref<1x1x64xf32, #tpu.memory_space<vmem>>, %arg14: memref<1x64x32xbf16, #tpu.memory_space<vmem>>, %arg15: memref<1x1x32xf32, #tpu.memory_space<vmem>>, %arg16: memref<1x1x32xf32, #tpu.memory_space<vmem>>, %arg17: memref<1x1x32xf32, #tpu.memory_space<vmem>>, %arg18: memref<32x32xbf16, #tpu.memory_space<vmem>>, %arg19: memref<1x32xf32, #tpu.memory_space<vmem>>, %arg20: memref<32x128xbf16, #tpu.memory_space<vmem>>, %arg21: memref<1x128xf32, #tpu.memory_space<vmem>>, %arg22: memref<1x8x32xf32, #tpu.memory_space<vmem>>, %arg23: memref<1x1x8x32xf32, #tpu.memory_space<vmem>>, %arg24: memref<1x8x128xf32, #tpu.memory_space<vmem>>, %arg25: memref<8x32xf32, #tpu.memory_space<vmem>>) attributes {dimension_semantics = [#tpu.dimension_semantics<parallel>, #tpu.dimension_semantics<arbitrary>], iteration_bounds = array<i64: 2, 2>, scalar_prefetch = 0 : i64, scratch_operands = 1 : i64, tpu.core_type = #tpu.core_type<tc>, window_params = [{transform_indices = @transform_0, window_bounds = array<i64: 1, 8, 32>}, {transform_indices = @transform_1, window_bounds = array<i64: 1, 1, 8>}, {pipeline_mode = #tpu.pipeline_mode<synchronous>, transform_indices = @transform_2, window_bounds = array<i64: 1, 32>}, {pipeline_mode = #tpu.pipeline_mode<synchronous>, transform_indices = @transform_3, window_bounds = array<i64: 1, 32>}, {transform_indices = @transform_4, window_bounds = array<i64: 1, 32, 96>}, {transform_indices = @transform_5, window_bounds = array<i64: 1, 1, 96>}, {transform_indices = @transform_6, window_bounds = array<i64: 1, 32, 32>}, {transform_indices = @transform_7, window_bounds = array<i64: 1, 1, 32>}, {transform_indices = @transform_8, window_bounds = array<i64: 1, 1, 32>}, {transform_indices = @transform_9, window_bounds = array<i64: 1, 1, 32>}, {transform_indices = @transform_10, window_bounds = array<i64: 1, 32, 64>}, {transform_indices = @transform_11, window_bounds = array<i64: 1, 1, 64>}, {transform_indices = @transform_12, window_bounds = array<i64: 1, 64, 32>}, {transform_indices = @transform_13, window_bounds = array<i64: 1, 1, 32>}, {transform_indices = @transform_14, window_bounds = array<i64: 1, 1, 32>}, {transform_indices = @transform_15, window_bounds = array<i64: 1, 1, 32>}, {pipeline_mode = #tpu.pipeline_mode<synchronous>, transform_indices = @transform_16, window_bounds = array<i64: 32, 32>}, {pipeline_mode = #tpu.pipeline_mode<synchronous>, transform_indices = @transform_17, window_bounds = array<i64: 1, 32>}, {pipeline_mode = #tpu.pipeline_mode<synchronous>, transform_indices = @transform_18, window_bounds = array<i64: 32, 128>}, {pipeline_mode = #tpu.pipeline_mode<synchronous>, transform_indices = @transform_19, window_bounds = array<i64: 1, 128>}, {transform_indices = @transform_20, window_bounds = array<i64: 1, 8, 32>}, {transform_indices = @transform_21, window_bounds = array<i64: 1, 1, 8, 32>}, {transform_indices = @transform_22, window_bounds = array<i64: 1, 8, 128>}]} {
    %c0_i32 = arith.constant 0 : i32
    %0 = arith.cmpi eq, %arg1, %c0_i32 : i32
    %1 = arith.extui %0 : i1 to i32
    %c0_i32_0 = arith.constant 0 : i32
    %2 = arith.cmpi ne, %1, %c0_i32_0 : i32
    scf.if %2 {
      %c0_85 = arith.constant 0 : index
      %c0_86 = arith.constant 0 : index
      %c0_87 = arith.constant 0 : index
      %203 = vector.load %arg2[%c0_85, %c0_86, %c0_87] : memref<1x8x32xf32, #tpu.memory_space<vmem>>, vector<1x8x32xf32>
      %204 = vector.shape_cast %203 : vector<1x8x32xf32> to vector<8x32xf32>
      %c0_88 = arith.constant 0 : index
      %c0_89 = arith.constant 0 : index
      %205 = vector.load %arg4[%c0_88, %c0_89] : memref<1x32xf32, #tpu.memory_space<vmem>>, vector<1x32xf32>
      %c0_90 = arith.constant 0 : index
      %c0_91 = arith.constant 0 : index
      %206 = vector.load %arg5[%c0_90, %c0_91] : memref<1x32xf32, #tpu.memory_space<vmem>>, vector<1x32xf32>
      %cst_92 = arith.constant dense<0.000000e+00> : vector<8xf32>
      %207 = vector.multi_reduction <add>, %204, %cst_92 [1] : vector<8x32xf32> to vector<8xf32>
      %208 = vector.shape_cast %207 : vector<8xf32> to vector<8x1xf32>
      %cst_93 = arith.constant 3.200000e+01 : f32
      %209 = vector.broadcast %cst_93 : f32 to vector<8x1xf32>
      %210 = arith.divf %208, %209 : vector<8x1xf32>
      %211 = vector.broadcast %210 : vector<8x1xf32> to vector<8x32xf32>
      %212 = arith.subf %204, %211 : vector<8x32xf32>
      %213 = arith.mulf %212, %212 : vector<8x32xf32>
      %cst_94 = arith.constant dense<0.000000e+00> : vector<8xf32>
      %214 = vector.multi_reduction <add>, %213, %cst_94 [1] : vector<8x32xf32> to vector<8xf32>
      %215 = vector.shape_cast %214 : vector<8xf32> to vector<8x1xf32>
      %cst_95 = arith.constant 3.200000e+01 : f32
      %216 = vector.broadcast %cst_95 : f32 to vector<8x1xf32>
      %217 = arith.divf %215, %216 : vector<8x1xf32>
      %cst_96 = arith.constant 9.99999996E-13 : f32
      %218 = vector.broadcast %cst_96 : f32 to vector<8x1xf32>
      %219 = arith.addf %217, %218 : vector<8x1xf32>
      %220 = math.rsqrt %219 : vector<8x1xf32>
      %221 = vector.broadcast %220 : vector<8x1xf32> to vector<8x32xf32>
      %222 = arith.mulf %212, %221 : vector<8x32xf32>
      %223 = vector.broadcast %205 : vector<1x32xf32> to vector<8x32xf32>
      %224 = arith.mulf %222, %223 : vector<8x32xf32>
      %225 = vector.broadcast %206 : vector<1x32xf32> to vector<8x32xf32>
      %226 = arith.addf %224, %225 : vector<8x32xf32>
      %c0_97 = arith.constant 0 : index
      %c0_98 = arith.constant 0 : index
      %227 = vector.load %arg25[%c0_97, %c0_98] : memref<8x32xf32, #tpu.memory_space<vmem>>, vector<8x32xf32>
      tpu.vector_store %arg25[%c0_97, %c0_98], %226 {strides = array<i32>} : memref<8x32xf32, #tpu.memory_space<vmem>>, vector<8x32xf32>,
      %c0_99 = arith.constant 0 : index
      %c0_100 = arith.constant 0 : index
      %c0_101 = arith.constant 0 : index
      %228 = vector.load %arg22[%c0_99, %c0_100, %c0_101] : memref<1x8x32xf32, #tpu.memory_space<vmem>>, vector<1x8x32xf32>
      %229 = vector.shape_cast %228 : vector<1x8x32xf32> to vector<8x32xf32>
      %230 = vector.shape_cast %226 : vector<8x32xf32> to vector<1x8x32xf32>
      tpu.vector_store %arg22[%c0_99, %c0_100, %c0_101], %230 {strides = array<i32>} : memref<1x8x32xf32, #tpu.memory_space<vmem>>, vector<1x8x32xf32>,
    } else {
    }
    %c0 = arith.constant 0 : index
    %c0_1 = arith.constant 0 : index
    %3 = vector.load %arg25[%c0, %c0_1] : memref<8x32xf32, #tpu.memory_space<vmem>>, vector<8x32xf32>
    %4 = arith.truncf %3 : vector<8x32xf32> to vector<8x32xbf16>
    %c0_2 = arith.constant 0 : index
    %c0_3 = arith.constant 0 : index
    %c0_4 = arith.constant 0 : index
    %5 = vector.load %arg6[%c0_2, %c0_3, %c0_4] : memref<1x32x96xbf16, #tpu.memory_space<vmem>>, vector<1x32x96xbf16>
    %6 = vector.shape_cast %5 : vector<1x32x96xbf16> to vector<32x96xbf16>
    %cst = arith.constant dense<0.000000e+00> : vector<8x96xf32>
    %7 = tpu.matmul %4, %6, %cst {dimension_numbers = #tpu.dot_dimension_numbers<[1], [0], [0], [1], [0, 0, 1, 1], [], []>} : vector<8x32xbf16>, vector<32x96xbf16>, vector<8x96xf32> -> vector<8x96xf32>
    %c0_5 = arith.constant 0 : index
    %c0_6 = arith.constant 0 : index
    %c0_7 = arith.constant 0 : index
    %8 = vector.load %arg7[%c0_5, %c0_6, %c0_7] : memref<1x1x96xf32, #tpu.memory_space<vmem>>, vector<1x1x96xf32>
    %9 = vector.shape_cast %8 : vector<1x1x96xf32> to vector<1x96xf32>
    %10 = vector.broadcast %9 : vector<1x96xf32> to vector<8x96xf32>
    %11 = arith.addf %7, %10 : vector<8x96xf32>
    %12 = vector.extract_strided_slice %11 {offsets = [0, 0], sizes = [8, 32], strides = [1, 1]} : vector<8x96xf32> to vector<8x32xf32>
    %13 = vector.extract_strided_slice %11 {offsets = [0, 32], sizes = [8, 32], strides = [1, 1]} : vector<8x96xf32> to vector<8x32xf32>
    %14 = tpu.transpose %13, [1, 0] : vector<8x32xf32> -> vector<32x8xf32>
    %15 = vector.extract_strided_slice %11 {offsets = [0, 64], sizes = [8, 32], strides = [1, 1]} : vector<8x96xf32> to vector<8x32xf32>
    %c0_8 = arith.constant 0 : index
    %c0_9 = arith.constant 0 : index
    %c0_10 = arith.constant 0 : index
    %16 = vector.load %arg3[%c0_8, %c0_9, %c0_10] : memref<1x1x8xf32, #tpu.memory_space<vmem>>, vector<1x1x8xf32>
    %17 = vector.shape_cast %16 : vector<1x1x8xf32> to vector<1x8xf32>
    %18 = vector.shape_cast %17 : vector<1x8xf32> to vector<1x8xf32>
    %19 = vector.broadcast %18 : vector<1x8xf32> to vector<8x8xf32>
    %20 = vector.extract_strided_slice %12 {offsets = [0, 0], sizes = [8, 8], strides = [1, 1]} : vector<8x32xf32> to vector<8x8xf32>
    %21 = arith.truncf %20 : vector<8x8xf32> to vector<8x8xbf16>
    %22 = vector.extract_strided_slice %14 {offsets = [0, 0], sizes = [8, 8], strides = [1, 1]} : vector<32x8xf32> to vector<8x8xf32>
    %23 = arith.truncf %22 : vector<8x8xf32> to vector<8x8xbf16>
    %24 = vector.extract_strided_slice %15 {offsets = [0, 0], sizes = [8, 8], strides = [1, 1]} : vector<8x32xf32> to vector<8x8xf32>
    %25 = arith.truncf %24 : vector<8x8xf32> to vector<8x8xbf16>
    %cst_11 = arith.constant dense<0.000000e+00> : vector<8x8xf32>
    %26 = tpu.matmul %21, %23, %cst_11 {dimension_numbers = #tpu.dot_dimension_numbers<[1], [0], [0], [1], [0, 0, 1, 1], [], []>} : vector<8x8xbf16>, vector<8x8xbf16>, vector<8x8xf32> -> vector<8x8xf32>
    %cst_12 = arith.constant 0.353553385 : f32
    %27 = vector.broadcast %cst_12 : f32 to vector<8x8xf32>
    %28 = arith.mulf %26, %27 : vector<8x8xf32>
    %29 = arith.addf %28, %19 : vector<8x8xf32>
    %cst_13 = arith.constant dense<0xFF800000> : vector<8xf32>
    %30 = vector.multi_reduction <maximumf>, %29, %cst_13 [1] : vector<8x8xf32> to vector<8xf32>
    %31 = vector.shape_cast %30 : vector<8xf32> to vector<8x1xf32>
    %32 = vector.broadcast %31 : vector<8x1xf32> to vector<8x8xf32>
    %33 = arith.subf %29, %32 : vector<8x8xf32>
    %34 = math.exp %33 : vector<8x8xf32>
    %cst_14 = arith.constant dense<0.000000e+00> : vector<8xf32>
    %35 = vector.multi_reduction <add>, %34, %cst_14 [1] : vector<8x8xf32> to vector<8xf32>
    %36 = vector.shape_cast %35 : vector<8xf32> to vector<8x1xf32>
    %37 = tpu.reciprocal %36 {approx = true} : vector<8x1xf32> -> vector<8x1xf32>
    %38 = vector.broadcast %37 : vector<8x1xf32> to vector<8x8xf32>
    %39 = arith.mulf %34, %38 : vector<8x8xf32>
    %40 = arith.truncf %39 : vector<8x8xf32> to vector<8x8xbf16>
    %cst_15 = arith.constant dense<0.000000e+00> : vector<8x8xf32>
    %41 = tpu.matmul %40, %25, %cst_15 {dimension_numbers = #tpu.dot_dimension_numbers<[1], [0], [0], [1], [0, 0, 1, 1], [], []>} : vector<8x8xbf16>, vector<8x8xbf16>, vector<8x8xf32> -> vector<8x8xf32>
    %42 = vector.extract_strided_slice %12 {offsets = [0, 8], sizes = [8, 8], strides = [1, 1]} : vector<8x32xf32> to vector<8x8xf32>
    %43 = arith.truncf %42 : vector<8x8xf32> to vector<8x8xbf16>
    %44 = vector.extract_strided_slice %14 {offsets = [8, 0], sizes = [8, 8], strides = [1, 1]} : vector<32x8xf32> to vector<8x8xf32>
    %45 = arith.truncf %44 : vector<8x8xf32> to vector<8x8xbf16>
    %46 = vector.extract_strided_slice %15 {offsets = [0, 8], sizes = [8, 8], strides = [1, 1]} : vector<8x32xf32> to vector<8x8xf32>
    %47 = arith.truncf %46 : vector<8x8xf32> to vector<8x8xbf16>
    %cst_16 = arith.constant dense<0.000000e+00> : vector<8x8xf32>
    %48 = tpu.matmul %43, %45, %cst_16 {dimension_numbers = #tpu.dot_dimension_numbers<[1], [0], [0], [1], [0, 0, 1, 1], [], []>} : vector<8x8xbf16>, vector<8x8xbf16>, vector<8x8xf32> -> vector<8x8xf32>
    %cst_17 = arith.constant 0.353553385 : f32
    %49 = vector.broadcast %cst_17 : f32 to vector<8x8xf32>
    %50 = arith.mulf %48, %49 : vector<8x8xf32>
    %51 = arith.addf %50, %19 : vector<8x8xf32>
    %cst_18 = arith.constant dense<0xFF800000> : vector<8xf32>
    %52 = vector.multi_reduction <maximumf>, %51, %cst_18 [1] : vector<8x8xf32> to vector<8xf32>
    %53 = vector.shape_cast %52 : vector<8xf32> to vector<8x1xf32>
    %54 = vector.broadcast %53 : vector<8x1xf32> to vector<8x8xf32>
    %55 = arith.subf %51, %54 : vector<8x8xf32>
    %56 = math.exp %55 : vector<8x8xf32>
    %cst_19 = arith.constant dense<0.000000e+00> : vector<8xf32>
    %57 = vector.multi_reduction <add>, %56, %cst_19 [1] : vector<8x8xf32> to vector<8xf32>
    %58 = vector.shape_cast %57 : vector<8xf32> to vector<8x1xf32>
    %59 = tpu.reciprocal %58 {approx = true} : vector<8x1xf32> -> vector<8x1xf32>
    %60 = vector.broadcast %59 : vector<8x1xf32> to vector<8x8xf32>
    %61 = arith.mulf %56, %60 : vector<8x8xf32>
    %62 = arith.truncf %61 : vector<8x8xf32> to vector<8x8xbf16>
    %cst_20 = arith.constant dense<0.000000e+00> : vector<8x8xf32>
    %63 = tpu.matmul %62, %47, %cst_20 {dimension_numbers = #tpu.dot_dimension_numbers<[1], [0], [0], [1], [0, 0, 1, 1], [], []>} : vector<8x8xbf16>, vector<8x8xbf16>, vector<8x8xf32> -> vector<8x8xf32>
    %64 = vector.extract_strided_slice %12 {offsets = [0, 16], sizes = [8, 8], strides = [1, 1]} : vector<8x32xf32> to vector<8x8xf32>
    %65 = arith.truncf %64 : vector<8x8xf32> to vector<8x8xbf16>
    %66 = vector.extract_strided_slice %14 {offsets = [16, 0], sizes = [8, 8], strides = [1, 1]} : vector<32x8xf32> to vector<8x8xf32>
    %67 = arith.truncf %66 : vector<8x8xf32> to vector<8x8xbf16>
    %68 = vector.extract_strided_slice %15 {offsets = [0, 16], sizes = [8, 8], strides = [1, 1]} : vector<8x32xf32> to vector<8x8xf32>
    %69 = arith.truncf %68 : vector<8x8xf32> to vector<8x8xbf16>
    %cst_21 = arith.constant dense<0.000000e+00> : vector<8x8xf32>
    %70 = tpu.matmul %65, %67, %cst_21 {dimension_numbers = #tpu.dot_dimension_numbers<[1], [0], [0], [1], [0, 0, 1, 1], [], []>} : vector<8x8xbf16>, vector<8x8xbf16>, vector<8x8xf32> -> vector<8x8xf32>
    %cst_22 = arith.constant 0.353553385 : f32
    %71 = vector.broadcast %cst_22 : f32 to vector<8x8xf32>
    %72 = arith.mulf %70, %71 : vector<8x8xf32>
    %73 = arith.addf %72, %19 : vector<8x8xf32>
    %cst_23 = arith.constant dense<0xFF800000> : vector<8xf32>
    %74 = vector.multi_reduction <maximumf>, %73, %cst_23 [1] : vector<8x8xf32> to vector<8xf32>
    %75 = vector.shape_cast %74 : vector<8xf32> to vector<8x1xf32>
    %76 = vector.broadcast %75 : vector<8x1xf32> to vector<8x8xf32>
    %77 = arith.subf %73, %76 : vector<8x8xf32>
    %78 = math.exp %77 : vector<8x8xf32>
    %cst_24 = arith.constant dense<0.000000e+00> : vector<8xf32>
    %79 = vector.multi_reduction <add>, %78, %cst_24 [1] : vector<8x8xf32> to vector<8xf32>
    %80 = vector.shape_cast %79 : vector<8xf32> to vector<8x1xf32>
    %81 = tpu.reciprocal %80 {approx = true} : vector<8x1xf32> -> vector<8x1xf32>
    %82 = vector.broadcast %81 : vector<8x1xf32> to vector<8x8xf32>
    %83 = arith.mulf %78, %82 : vector<8x8xf32>
    %84 = arith.truncf %83 : vector<8x8xf32> to vector<8x8xbf16>
    %cst_25 = arith.constant dense<0.000000e+00> : vector<8x8xf32>
    %85 = tpu.matmul %84, %69, %cst_25 {dimension_numbers = #tpu.dot_dimension_numbers<[1], [0], [0], [1], [0, 0, 1, 1], [], []>} : vector<8x8xbf16>, vector<8x8xbf16>, vector<8x8xf32> -> vector<8x8xf32>
    %86 = vector.extract_strided_slice %12 {offsets = [0, 24], sizes = [8, 8], strides = [1, 1]} : vector<8x32xf32> to vector<8x8xf32>
    %87 = arith.truncf %86 : vector<8x8xf32> to vector<8x8xbf16>
    %88 = vector.extract_strided_slice %14 {offsets = [24, 0], sizes = [8, 8], strides = [1, 1]} : vector<32x8xf32> to vector<8x8xf32>
    %89 = arith.truncf %88 : vector<8x8xf32> to vector<8x8xbf16>
    %90 = vector.extract_strided_slice %15 {offsets = [0, 24], sizes = [8, 8], strides = [1, 1]} : vector<8x32xf32> to vector<8x8xf32>
    %91 = arith.truncf %90 : vector<8x8xf32> to vector<8x8xbf16>
    %cst_26 = arith.constant dense<0.000000e+00> : vector<8x8xf32>
    %92 = tpu.matmul %87, %89, %cst_26 {dimension_numbers = #tpu.dot_dimension_numbers<[1], [0], [0], [1], [0, 0, 1, 1], [], []>} : vector<8x8xbf16>, vector<8x8xbf16>, vector<8x8xf32> -> vector<8x8xf32>
    %cst_27 = arith.constant 0.353553385 : f32
    %93 = vector.broadcast %cst_27 : f32 to vector<8x8xf32>
    %94 = arith.mulf %92, %93 : vector<8x8xf32>
    %95 = arith.addf %94, %19 : vector<8x8xf32>
    %cst_28 = arith.constant dense<0xFF800000> : vector<8xf32>
    %96 = vector.multi_reduction <maximumf>, %95, %cst_28 [1] : vector<8x8xf32> to vector<8xf32>
    %97 = vector.shape_cast %96 : vector<8xf32> to vector<8x1xf32>
    %98 = vector.broadcast %97 : vector<8x1xf32> to vector<8x8xf32>
    %99 = arith.subf %95, %98 : vector<8x8xf32>
    %100 = math.exp %99 : vector<8x8xf32>
    %cst_29 = arith.constant dense<0.000000e+00> : vector<8xf32>
    %101 = vector.multi_reduction <add>, %100, %cst_29 [1] : vector<8x8xf32> to vector<8xf32>
    %102 = vector.shape_cast %101 : vector<8xf32> to vector<8x1xf32>
    %103 = tpu.reciprocal %102 {approx = true} : vector<8x1xf32> -> vector<8x1xf32>
    %104 = vector.broadcast %103 : vector<8x1xf32> to vector<8x8xf32>
    %105 = arith.mulf %100, %104 : vector<8x8xf32>
    %106 = arith.truncf %105 : vector<8x8xf32> to vector<8x8xbf16>
    %cst_30 = arith.constant dense<0.000000e+00> : vector<8x8xf32>
    %107 = tpu.matmul %106, %91, %cst_30 {dimension_numbers = #tpu.dot_dimension_numbers<[1], [0], [0], [1], [0, 0, 1, 1], [], []>} : vector<8x8xbf16>, vector<8x8xbf16>, vector<8x8xf32> -> vector<8x8xf32>
    %108 = tpu.concatenate %41, %63, %85, %107 in 1 : vector<8x8xf32>, vector<8x8xf32>, vector<8x8xf32>, vector<8x8xf32> -> vector<8x32xf32>
    %109 = arith.truncf %108 : vector<8x32xf32> to vector<8x32xbf16>
    %c0_31 = arith.constant 0 : index
    %c0_32 = arith.constant 0 : index
    %c0_33 = arith.constant 0 : index
    %110 = vector.load %arg8[%c0_31, %c0_32, %c0_33] : memref<1x32x32xbf16, #tpu.memory_space<vmem>>, vector<1x32x32xbf16>
    %111 = vector.shape_cast %110 : vector<1x32x32xbf16> to vector<32x32xbf16>
    %cst_34 = arith.constant dense<0.000000e+00> : vector<8x32xf32>
    %112 = tpu.matmul %109, %111, %cst_34 {dimension_numbers = #tpu.dot_dimension_numbers<[1], [0], [0], [1], [0, 0, 1, 1], [], []>} : vector<8x32xbf16>, vector<32x32xbf16>, vector<8x32xf32> -> vector<8x32xf32>
    %c0_35 = arith.constant 0 : index
    %c0_36 = arith.constant 0 : index
    %c0_37 = arith.constant 0 : index
    %113 = vector.load %arg9[%c0_35, %c0_36, %c0_37] : memref<1x1x32xf32, #tpu.memory_space<vmem>>, vector<1x1x32xf32>
    %114 = vector.shape_cast %113 : vector<1x1x32xf32> to vector<1x32xf32>
    %115 = vector.broadcast %114 : vector<1x32xf32> to vector<8x32xf32>
    %116 = arith.addf %112, %115 : vector<8x32xf32>
    %117 = arith.addf %116, %3 : vector<8x32xf32>
    %c0_38 = arith.constant 0 : index
    %c0_39 = arith.constant 0 : index
    %c0_40 = arith.constant 0 : index
    %118 = vector.load %arg10[%c0_38, %c0_39, %c0_40] : memref<1x1x32xf32, #tpu.memory_space<vmem>>, vector<1x1x32xf32>
    %119 = vector.shape_cast %118 : vector<1x1x32xf32> to vector<1x32xf32>
    %c0_41 = arith.constant 0 : index
    %c0_42 = arith.constant 0 : index
    %c0_43 = arith.constant 0 : index
    %120 = vector.load %arg11[%c0_41, %c0_42, %c0_43] : memref<1x1x32xf32, #tpu.memory_space<vmem>>, vector<1x1x32xf32>
    %121 = vector.shape_cast %120 : vector<1x1x32xf32> to vector<1x32xf32>
    %cst_44 = arith.constant dense<0.000000e+00> : vector<8xf32>
    %122 = vector.multi_reduction <add>, %117, %cst_44 [1] : vector<8x32xf32> to vector<8xf32>
    %123 = vector.shape_cast %122 : vector<8xf32> to vector<8x1xf32>
    %cst_45 = arith.constant 3.200000e+01 : f32
    %124 = vector.broadcast %cst_45 : f32 to vector<8x1xf32>
    %125 = arith.divf %123, %124 : vector<8x1xf32>
    %126 = vector.broadcast %125 : vector<8x1xf32> to vector<8x32xf32>
    %127 = arith.subf %117, %126 : vector<8x32xf32>
    %128 = arith.mulf %127, %127 : vector<8x32xf32>
    %cst_46 = arith.constant dense<0.000000e+00> : vector<8xf32>
    %129 = vector.multi_reduction <add>, %128, %cst_46 [1] : vector<8x32xf32> to vector<8xf32>
    %130 = vector.shape_cast %129 : vector<8xf32> to vector<8x1xf32>
    %cst_47 = arith.constant 3.200000e+01 : f32
    %131 = vector.broadcast %cst_47 : f32 to vector<8x1xf32>
    %132 = arith.divf %130, %131 : vector<8x1xf32>
    %cst_48 = arith.constant 9.99999996E-13 : f32
    %133 = vector.broadcast %cst_48 : f32 to vector<8x1xf32>
    %134 = arith.addf %132, %133 : vector<8x1xf32>
    %135 = math.rsqrt %134 : vector<8x1xf32>
    %136 = vector.broadcast %135 : vector<8x1xf32> to vector<8x32xf32>
    %137 = arith.mulf %127, %136 : vector<8x32xf32>
    %138 = vector.broadcast %119 : vector<1x32xf32> to vector<8x32xf32>
    %139 = arith.mulf %137, %138 : vector<8x32xf32>
    %140 = vector.broadcast %121 : vector<1x32xf32> to vector<8x32xf32>
    %141 = arith.addf %139, %140 : vector<8x32xf32>
    %142 = arith.truncf %141 : vector<8x32xf32> to vector<8x32xbf16>
    %c0_49 = arith.constant 0 : index
    %c0_50 = arith.constant 0 : index
    %c0_51 = arith.constant 0 : index
    %143 = vector.load %arg12[%c0_49, %c0_50, %c0_51] : memref<1x32x64xbf16, #tpu.memory_space<vmem>>, vector<1x32x64xbf16>
    %144 = vector.shape_cast %143 : vector<1x32x64xbf16> to vector<32x64xbf16>
    %cst_52 = arith.constant dense<0.000000e+00> : vector<8x64xf32>
    %145 = tpu.matmul %142, %144, %cst_52 {dimension_numbers = #tpu.dot_dimension_numbers<[1], [0], [0], [1], [0, 0, 1, 1], [], []>} : vector<8x32xbf16>, vector<32x64xbf16>, vector<8x64xf32> -> vector<8x64xf32>
    %c0_53 = arith.constant 0 : index
    %c0_54 = arith.constant 0 : index
    %c0_55 = arith.constant 0 : index
    %146 = vector.load %arg13[%c0_53, %c0_54, %c0_55] : memref<1x1x64xf32, #tpu.memory_space<vmem>>, vector<1x1x64xf32>
    %147 = vector.shape_cast %146 : vector<1x1x64xf32> to vector<1x64xf32>
    %148 = vector.broadcast %147 : vector<1x64xf32> to vector<8x64xf32>
    %149 = arith.addf %145, %148 : vector<8x64xf32>
    %cst_56 = arith.constant 5.000000e-01 : f32
    %150 = vector.broadcast %cst_56 : f32 to vector<8x64xf32>
    %151 = arith.mulf %150, %149 : vector<8x64xf32>
    %cst_57 = arith.constant 4.471500e-02 : f32
    %152 = vector.broadcast %cst_57 : f32 to vector<8x64xf32>
    %153 = arith.mulf %152, %149 : vector<8x64xf32>
    %154 = arith.mulf %153, %149 : vector<8x64xf32>
    %155 = arith.mulf %154, %149 : vector<8x64xf32>
    %156 = arith.addf %149, %155 : vector<8x64xf32>
    %cst_58 = arith.constant 0.797884583 : f32
    %157 = vector.broadcast %cst_58 : f32 to vector<8x64xf32>
    %158 = arith.mulf %157, %156 : vector<8x64xf32>
    %159 = math.tanh %158 : vector<8x64xf32>
    %cst_59 = arith.constant 1.000000e+00 : f32
    %160 = vector.broadcast %cst_59 : f32 to vector<8x64xf32>
    %161 = arith.addf %160, %159 : vector<8x64xf32>
    %162 = arith.mulf %151, %161 : vector<8x64xf32>
    %163 = arith.truncf %162 : vector<8x64xf32> to vector<8x64xbf16>
    %c0_60 = arith.constant 0 : index
    %c0_61 = arith.constant 0 : index
    %c0_62 = arith.constant 0 : index
    %164 = vector.load %arg14[%c0_60, %c0_61, %c0_62] : memref<1x64x32xbf16, #tpu.memory_space<vmem>>, vector<1x64x32xbf16>
    %165 = vector.shape_cast %164 : vector<1x64x32xbf16> to vector<64x32xbf16>
    %cst_63 = arith.constant dense<0.000000e+00> : vector<8x32xf32>
    %166 = tpu.matmul %163, %165, %cst_63 {dimension_numbers = #tpu.dot_dimension_numbers<[1], [0], [0], [1], [0, 0, 1, 1], [], []>} : vector<8x64xbf16>, vector<64x32xbf16>, vector<8x32xf32> -> vector<8x32xf32>
    %c0_64 = arith.constant 0 : index
    %c0_65 = arith.constant 0 : index
    %c0_66 = arith.constant 0 : index
    %167 = vector.load %arg15[%c0_64, %c0_65, %c0_66] : memref<1x1x32xf32, #tpu.memory_space<vmem>>, vector<1x1x32xf32>
    %168 = vector.shape_cast %167 : vector<1x1x32xf32> to vector<1x32xf32>
    %169 = vector.broadcast %168 : vector<1x32xf32> to vector<8x32xf32>
    %170 = arith.addf %166, %169 : vector<8x32xf32>
    %171 = arith.addf %170, %141 : vector<8x32xf32>
    %c0_67 = arith.constant 0 : index
    %c0_68 = arith.constant 0 : index
    %c0_69 = arith.constant 0 : index
    %172 = vector.load %arg16[%c0_67, %c0_68, %c0_69] : memref<1x1x32xf32, #tpu.memory_space<vmem>>, vector<1x1x32xf32>
    %173 = vector.shape_cast %172 : vector<1x1x32xf32> to vector<1x32xf32>
    %c0_70 = arith.constant 0 : index
    %c0_71 = arith.constant 0 : index
    %c0_72 = arith.constant 0 : index
    %174 = vector.load %arg17[%c0_70, %c0_71, %c0_72] : memref<1x1x32xf32, #tpu.memory_space<vmem>>, vector<1x1x32xf32>
    %175 = vector.shape_cast %174 : vector<1x1x32xf32> to vector<1x32xf32>
    %cst_73 = arith.constant dense<0.000000e+00> : vector<8xf32>
    %176 = vector.multi_reduction <add>, %171, %cst_73 [1] : vector<8x32xf32> to vector<8xf32>
    %177 = vector.shape_cast %176 : vector<8xf32> to vector<8x1xf32>
    %cst_74 = arith.constant 3.200000e+01 : f32
    %178 = vector.broadcast %cst_74 : f32 to vector<8x1xf32>
    %179 = arith.divf %177, %178 : vector<8x1xf32>
    %180 = vector.broadcast %179 : vector<8x1xf32> to vector<8x32xf32>
    %181 = arith.subf %171, %180 : vector<8x32xf32>
    %182 = arith.mulf %181, %181 : vector<8x32xf32>
    %cst_75 = arith.constant dense<0.000000e+00> : vector<8xf32>
    %183 = vector.multi_reduction <add>, %182, %cst_75 [1] : vector<8x32xf32> to vector<8xf32>
    %184 = vector.shape_cast %183 : vector<8xf32> to vector<8x1xf32>
    %cst_76 = arith.constant 3.200000e+01 : f32
    %185 = vector.broadcast %cst_76 : f32 to vector<8x1xf32>
    %186 = arith.divf %184, %185 : vector<8x1xf32>
    %cst_77 = arith.constant 9.99999996E-13 : f32
    %187 = vector.broadcast %cst_77 : f32 to vector<8x1xf32>
    %188 = arith.addf %186, %187 : vector<8x1xf32>
    %189 = math.rsqrt %188 : vector<8x1xf32>
    %190 = vector.broadcast %189 : vector<8x1xf32> to vector<8x32xf32>
    %191 = arith.mulf %181, %190 : vector<8x32xf32>
    %192 = vector.broadcast %173 : vector<1x32xf32> to vector<8x32xf32>
    %193 = arith.mulf %191, %192 : vector<8x32xf32>
    %194 = vector.broadcast %175 : vector<1x32xf32> to vector<8x32xf32>
    %195 = arith.addf %193, %194 : vector<8x32xf32>
    %c0_78 = arith.constant 0 : index
    %c0_79 = arith.constant 0 : index
    %196 = vector.load %arg25[%c0_78, %c0_79] : memref<8x32xf32, #tpu.memory_space<vmem>>, vector<8x32xf32>
    tpu.vector_store %arg25[%c0_78, %c0_79], %195 {strides = array<i32>} : memref<8x32xf32, #tpu.memory_space<vmem>>, vector<8x32xf32>,
    %c0_80 = arith.constant 0 : index
    %c0_81 = arith.constant 0 : index
    %c0_82 = arith.constant 0 : index
    %c0_83 = arith.constant 0 : index
    %197 = vector.load %arg23[%c0_80, %c0_81, %c0_82, %c0_83] : memref<1x1x8x32xf32, #tpu.memory_space<vmem>>, vector<1x1x8x32xf32>
    %198 = vector.shape_cast %197 : vector<1x1x8x32xf32> to vector<8x32xf32>
    %199 = vector.shape_cast %195 : vector<8x32xf32> to vector<1x1x8x32xf32>
    tpu.vector_store %arg23[%c0_80, %c0_81, %c0_82, %c0_83], %199 {strides = array<i32>} : memref<1x1x8x32xf32, #tpu.memory_space<vmem>>, vector<1x1x8x32xf32>,
    %c1_i32 = arith.constant 1 : i32
    %200 = arith.cmpi eq, %arg1, %c1_i32 : i32
    %201 = arith.extui %200 : i1 to i32
    %c0_i32_84 = arith.constant 0 : i32
    %202 = arith.cmpi ne, %201, %c0_i32_84 : i32
    scf.if %202 {
      %203 = vector.extract_strided_slice %195 {offsets = [0, 0], sizes = [1, 32], strides = [1, 1]} : vector<8x32xf32> to vector<1x32xf32>
      %204 = arith.truncf %203 : vector<1x32xf32> to vector<1x32xbf16>
      %c0_85 = arith.constant 0 : index
      %c0_86 = arith.constant 0 : index
      %205 = vector.load %arg18[%c0_85, %c0_86] : memref<32x32xbf16, #tpu.memory_space<vmem>>, vector<32x32xbf16>
      %cst_87 = arith.constant dense<0.000000e+00> : vector<1x32xf32>
      %206 = tpu.matmul %204, %205, %cst_87 {dimension_numbers = #tpu.dot_dimension_numbers<[1], [0], [0], [1], [0, 0, 1, 1], [], []>} : vector<1x32xbf16>, vector<32x32xbf16>, vector<1x32xf32> -> vector<1x32xf32>
      %c0_88 = arith.constant 0 : index
      %c0_89 = arith.constant 0 : index
      %207 = vector.load %arg19[%c0_88, %c0_89] : memref<1x32xf32, #tpu.memory_space<vmem>>, vector<1x32xf32>
      %208 = arith.addf %206, %207 : vector<1x32xf32>
      %209 = math.tanh %208 : vector<1x32xf32>
      %210 = arith.truncf %209 : vector<1x32xf32> to vector<1x32xbf16>
      %c0_90 = arith.constant 0 : index
      %c0_91 = arith.constant 0 : index
      %211 = vector.load %arg20[%c0_90, %c0_91] : memref<32x128xbf16, #tpu.memory_space<vmem>>, vector<32x128xbf16>
      %cst_92 = arith.constant dense<0.000000e+00> : vector<1x128xf32>
      %212 = tpu.matmul %210, %211, %cst_92 {dimension_numbers = #tpu.dot_dimension_numbers<[1], [0], [0], [1], [0, 0, 1, 1], [], []>} : vector<1x32xbf16>, vector<32x128xbf16>, vector<1x128xf32> -> vector<1x128xf32>
      %c0_93 = arith.constant 0 : index
      %c0_94 = arith.constant 0 : index
      %213 = vector.load %arg21[%c0_93, %c0_94] : memref<1x128xf32, #tpu.memory_space<vmem>>, vector<1x128xf32>
      %214 = arith.addf %212, %213 : vector<1x128xf32>
      %215 = vector.shape_cast %214 : vector<1x128xf32> to vector<1x128xf32>
      %216 = vector.broadcast %215 : vector<1x128xf32> to vector<8x128xf32>
      %c0_95 = arith.constant 0 : index
      %c0_96 = arith.constant 0 : index
      %c0_97 = arith.constant 0 : index
      %217 = vector.load %arg24[%c0_95, %c0_96, %c0_97] : memref<1x8x128xf32, #tpu.memory_space<vmem>>, vector<1x8x128xf32>
      %218 = vector.shape_cast %217 : vector<1x8x128xf32> to vector<8x128xf32>
      %219 = vector.shape_cast %216 : vector<8x128xf32> to vector<1x8x128xf32>
      tpu.vector_store %arg24[%c0_95, %c0_96, %c0_97], %219 {strides = array<i32>} : memref<1x8x128xf32, #tpu.memory_space<vmem>>, vector<1x8x128xf32>,
    } else {
    }
    return
  }
  func.func @transform_0(%arg0: i32, %arg1: i32) -> (i32, i32, i32) {
    %c0_i32 = arith.constant 0 : i32
    %c0_i32_0 = arith.constant 0 : i32
    %c0_i32_1 = arith.constant 0 : i32
    return %arg0, %c0_i32, %c0_i32_0 : i32, i32, i32
  }
  func.func @transform_1(%arg0: i32, %arg1: i32) -> (i32, i32, i32) {
    %c0_i32 = arith.constant 0 : i32
    %c0_i32_0 = arith.constant 0 : i32
    %c0_i32_1 = arith.constant 0 : i32
    return %arg0, %c0_i32, %c0_i32_0 : i32, i32, i32
  }
  func.func @transform_2(%arg0: i32, %arg1: i32) -> (i32, i32) {
    %c0_i32 = arith.constant 0 : i32
    %c0_i32_0 = arith.constant 0 : i32
    %c0_i32_1 = arith.constant 0 : i32
    return %c0_i32, %c0_i32_0 : i32, i32
  }
  func.func @transform_3(%arg0: i32, %arg1: i32) -> (i32, i32) {
    %c0_i32 = arith.constant 0 : i32
    %c0_i32_0 = arith.constant 0 : i32
    %c0_i32_1 = arith.constant 0 : i32
    return %c0_i32, %c0_i32_0 : i32, i32
  }
  func.func @transform_4(%arg0: i32, %arg1: i32) -> (i32, i32, i32) {
    %c0_i32 = arith.constant 0 : i32
    %c0_i32_0 = arith.constant 0 : i32
    %c0_i32_1 = arith.constant 0 : i32
    return %arg1, %c0_i32, %c0_i32_0 : i32, i32, i32
  }
  func.func @transform_5(%arg0: i32, %arg1: i32) -> (i32, i32, i32) {
    %c0_i32 = arith.constant 0 : i32
    %c0_i32_0 = arith.constant 0 : i32
    %c0_i32_1 = arith.constant 0 : i32
    return %arg1, %c0_i32, %c0_i32_0 : i32, i32, i32
  }
  func.func @transform_6(%arg0: i32, %arg1: i32) -> (i32, i32, i32) {
    %c0_i32 = arith.constant 0 : i32
    %c0_i32_0 = arith.constant 0 : i32
    %c0_i32_1 = arith.constant 0 : i32
    return %arg1, %c0_i32, %c0_i32_0 : i32, i32, i32
  }
  func.func @transform_7(%arg0: i32, %arg1: i32) -> (i32, i32, i32) {
    %c0_i32 = arith.constant 0 : i32
    %c0_i32_0 = arith.constant 0 : i32
    %c0_i32_1 = arith.constant 0 : i32
    return %arg1, %c0_i32, %c0_i32_0 : i32, i32, i32
  }
  func.func @transform_8(%arg0: i32, %arg1: i32) -> (i32, i32, i32) {
    %c0_i32 = arith.constant 0 : i32
    %c0_i32_0 = arith.constant 0 : i32
    %c0_i32_1 = arith.constant 0 : i32
    return %arg1, %c0_i32, %c0_i32_0 : i32, i32, i32
  }
  func.func @transform_9(%arg0: i32, %arg1: i32) -> (i32, i32, i32) {
    %c0_i32 = arith.constant 0 : i32
    %c0_i32_0 = arith.constant 0 : i32
    %c0_i32_1 = arith.constant 0 : i32
    return %arg1, %c0_i32, %c0_i32_0 : i32, i32, i32
  }
  func.func @transform_10(%arg0: i32, %arg1: i32) -> (i32, i32, i32) {
    %c0_i32 = arith.constant 0 : i32
    %c0_i32_0 = arith.constant 0 : i32
    %c0_i32_1 = arith.constant 0 : i32
    return %arg1, %c0_i32, %c0_i32_0 : i32, i32, i32
  }
  func.func @transform_11(%arg0: i32, %arg1: i32) -> (i32, i32, i32) {
    %c0_i32 = arith.constant 0 : i32
    %c0_i32_0 = arith.constant 0 : i32
    %c0_i32_1 = arith.constant 0 : i32
    return %arg1, %c0_i32, %c0_i32_0 : i32, i32, i32
  }
  func.func @transform_12(%arg0: i32, %arg1: i32) -> (i32, i32, i32) {
    %c0_i32 = arith.constant 0 : i32
    %c0_i32_0 = arith.constant 0 : i32
    %c0_i32_1 = arith.constant 0 : i32
    return %arg1, %c0_i32, %c0_i32_0 : i32, i32, i32
  }
  func.func @transform_13(%arg0: i32, %arg1: i32) -> (i32, i32, i32) {
    %c0_i32 = arith.constant 0 : i32
    %c0_i32_0 = arith.constant 0 : i32
    %c0_i32_1 = arith.constant 0 : i32
    return %arg1, %c0_i32, %c0_i32_0 : i32, i32, i32
  }
  func.func @transform_14(%arg0: i32, %arg1: i32) -> (i32, i32, i32) {
    %c0_i32 = arith.constant 0 : i32
    %c0_i32_0 = arith.constant 0 : i32
    %c0_i32_1 = arith.constant 0 : i32
    return %arg1, %c0_i32, %c0_i32_0 : i32, i32, i32
  }
  func.func @transform_15(%arg0: i32, %arg1: i32) -> (i32, i32, i32) {
    %c0_i32 = arith.constant 0 : i32
    %c0_i32_0 = arith.constant 0 : i32
    %c0_i32_1 = arith.constant 0 : i32
    return %arg1, %c0_i32, %c0_i32_0 : i32, i32, i32
  }
  func.func @transform_16(%arg0: i32, %arg1: i32) -> (i32, i32) {
    %c0_i32 = arith.constant 0 : i32
    %c0_i32_0 = arith.constant 0 : i32
    %c0_i32_1 = arith.constant 0 : i32
    return %c0_i32, %c0_i32_0 : i32, i32
  }
  func.func @transform_17(%arg0: i32, %arg1: i32) -> (i32, i32) {
    %c0_i32 = arith.constant 0 : i32
    %c0_i32_0 = arith.constant 0 : i32
    %c0_i32_1 = arith.constant 0 : i32
    return %c0_i32, %c0_i32_0 : i32, i32
  }
  func.func @transform_18(%arg0: i32, %arg1: i32) -> (i32, i32) {
    %c0_i32 = arith.constant 0 : i32
    %c0_i32_0 = arith.constant 0 : i32
    %c0_i32_1 = arith.constant 0 : i32
    return %c0_i32, %c0_i32_0 : i32, i32
  }
  func.func @transform_19(%arg0: i32, %arg1: i32) -> (i32, i32) {
    %c0_i32 = arith.constant 0 : i32
    %c0_i32_0 = arith.constant 0 : i32
    %c0_i32_1 = arith.constant 0 : i32
    return %c0_i32, %c0_i32_0 : i32, i32
  }
  func.func @transform_20(%arg0: i32, %arg1: i32) -> (i32, i32, i32) {
    %c0_i32 = arith.constant 0 : i32
    %c0_i32_0 = arith.constant 0 : i32
    %c0_i32_1 = arith.constant 0 : i32
    return %arg0, %c0_i32, %c0_i32_0 : i32, i32, i32
  }
  func.func @transform_21(%arg0: i32, %arg1: i32) -> (i32, i32, i32, i32) {
    %c0_i32 = arith.constant 0 : i32
    %c0_i32_0 = arith.constant 0 : i32
    %c0_i32_1 = arith.constant 0 : i32
    return %arg1, %arg0, %c0_i32, %c0_i32_0 : i32, i32, i32, i32
  }
  func.func @transform_22(%arg0: i32, %arg1: i32) -> (i32, i32, i32) {
    %c0_i32 = arith.constant 0 : i32
    %c0_i32_0 = arith.constant 0 : i32
    %c0_i32_1 = arith.constant 0 : i32
    return %arg0, %c0_i32, %c0_i32_0 : i32, i32, i32
  }
}

</mosaic_0001>

<bundles_post_ra>
// kernel: bert_combine_forward.1
= control target key start
LH: loop header
LB: loop body
LE: loop exit
PB: predicated region body
PF: predicated region fallthrough
CT: control target
= control target key end

     0   :  { %s2699_s0 = inlined_call_operand.vmem [shape: f32[2,8,32], index: 0, kind: input, shape index: {}]   ;;  %s2700_s1 = inlined_call_operand.vmem [shape: f32[2,1,8], index: 1, kind: input, shape index: {}]   ;;  %s2701_s2 = inlined_call_operand.vmem [shape: f32[1,32], index: 2, kind: input, shape index: {}]   ;;  %s2702_s3 = inlined_call_operand.vmem [shape: f32[1,32], index: 3, kind: input, shape index: {}]   ;;  %s2703_s4 = inlined_call_operand.vmem [shape: bf16[2,32,96], index: 4, kind: input, shape index: {}]   ;;  %s2704_s5 = inlined_call_operand.vmem [shape: f32[2,1,96], index: 5, kind: input, shape index: {}]   ;;  %s2705_s6 = inlined_call_operand.vmem [shape: bf16[2,32,32], index: 6, kind: input, shape index: {}]   ;;  %s2706_s7 = inlined_call_operand.vmem [shape: f32[2,1,32], index: 7, kind: input, shape index: {}]   ;;  %s2707_s8 = inlined_call_operand.vmem [shape: f32[2,1,32], index: 8, kind: input, shape index: {}]   ;;  %s2708_s9 = inlined_call_operand.vmem [shape: f32[2,1,32], index: 9, kind: input, shape index: {}]   ;;  %s2709_s10 = inlined_call_operand.vmem [shape: bf16[2,32,64], index: 10, kind: input, shape index: {}]   ;;  %s2710_s11 = inlined_call_operand.vmem [shape: f32[2,1,64], index: 11, kind: input, shape index: {}]   ;;  %s2711_s12 = inlined_call_operand.vmem [shape: bf16[2,64,32], index: 12, kind: input, shape index: {}]   ;;  %s2712_s13 = inlined_call_operand.vmem [shape: f32[2,1,32], index: 13, kind: input, shape index: {}]   ;;  %s2713_s14 = inlined_call_operand.vmem [shape: f32[2,1,32], index: 14, kind: input, shape index: {}]   ;;  %s2714_s15 = inlined_call_operand.vmem [shape: f32[2,1,32], index: 15, kind: input, shape index: {}]   ;;  %s2715_s16 = inlined_call_operand.vmem [shape: bf16[32,32], index: 16, kind: input, shape index: {}]   ;;  %s2716_s17 = inlined_call_operand.vmem [shape: f32[1,32], index: 17, kind: input, shape index: {}]   ;;  %s2717_s18 = inlined_call_operand.vmem [shape: bf16[32,128], index: 18, kind: input, shape index: {}]   ;;  %s2718_s19 = inlined_call_operand.vmem [shape: f32[1,128], index: 19, kind: input, shape index: {}]   ;;  %s2719_s20 = inlined_call_operand.hbm [shape: f32[2,8,32], index: 20, kind: output, shape index: {0}]   ;;  %s2720_s21 = inlined_call_operand.vmem [shape: f32[2,2,8,32], index: 21, kind: output, shape index: {1}]   ;;  %s2721_s22 = inlined_call_operand.vmem [shape: f32[2,8,128], index: 22, kind: output, shape index: {2}]  }
   0x1   :  { %2740 = sst [smem:[#allocation20_spill]] %s2699_s0 }
   0x2   :  { %2741 = sst [smem:[#allocation21_spill]] %s2700_s1 }
   0x3   :  { %2742 = sst [smem:[#allocation22_spill]] %s2701_s2 }
   0x4   :  { %2743 = sst [smem:[#allocation23_spill]] %s2702_s3 }
   0x5   :  { %2744 = sst [smem:[#allocation24_spill]] %s2703_s4 }
   0x6   :  { %2745 = sst [smem:[#allocation25_spill]] %s2704_s5 }
   0x7   :  { %2746 = sst [smem:[#allocation26_spill]] %s2705_s6 }
   0x8   :  { %2747 = sst [smem:[#allocation27_spill]] %s2708_s9 }
   0x9   :  { %2748 = sst [smem:[#allocation28_spill]] %s2709_s10 }
   0xa   :  { %2749 = sst [smem:[#allocation29_spill]] %s2710_s11 }
   0xb   :  { %2750 = sst [smem:[#allocation30_spill]] %s2711_s12 }
   0xc   :  { %2751 = sst [smem:[#allocation31_spill]] %s2714_s15 }
   0xd   :  { %2752 = sst [smem:[#allocation32_spill]] %s2715_s16 }
   0xe   :  { %2753 = sst [smem:[#allocation33_spill]] %s2716_s17 }
   0xf   :  { %2754 = sst [smem:[#allocation34_spill]] %s2717_s18 }
  0x10   :  { %2755 = sst [smem:[#allocation35_spill]] %s2718_s19 }
  0x11   :  { %2756 = sst [smem:[#allocation36_spill]] %s2719_s20 }
  0x12   :  { %2757 = sst [smem:[#allocation37_spill]] %s2720_s21 }
  0x13   :  { %2758 = sst [smem:[#allocation38_spill]] %s2721_s22 }
  0x14   :  { %28 = vsyncpa [#allocation4], 0 }
  0x15   :  { %30 = vsyncpa [#allocation4 + $0x1], 0  ;;  %s2344_s3 = smov 0   ;;  %s2346_s28 = smov 0  }
  0x16   :  { %s2348_s29 = smov 0   ;;  %s2350_s30 = smov 0  }
  0x17   :  { %s2352_s4 = smov 0   ;;  %s2354_s0 = smov 0  }
  0x18   :  { %s2356_s23 = smov 0   ;;  %s2358_s1 = smov 0  }
  0x19 LB: > { %2759 = sst [smem:[#allocation6_spill]] %s2186_s3  ;;  %s1882_s5 = sadd.s32 4294967295, %s2214_s1   ;;  %s2214_s1 = sphi %s2358_s1, %s36_s1   ;;  %s2210_s23 = sphi %s2356_s23, %s2822_s23   ;;  %s2206_s0 = sphi %s2354_s0, %s2821_s0   ;;  %s2202_s4 = sphi %s2352_s4, %s2820_s4   ;;  %s2198_s30 = sphi %s2350_s30, %s2819_s30   ;;  %s2194_s29 = sphi %s2348_s29, %s2818_s29   ;;  %s2190_s28 = sphi %s2346_s28, %s2817_s28   ;;  %s2186_s3 = sphi %s2344_s3, %s2816_s3  }
  0x1a   : > { %2760 = sst [smem:[#allocation7_spill]] %s2190_s28  ;;  %s1883_s24 = sadd.s32 4294967294, %s2214_s1  }
  0x1b   : > { %2761 = sst [smem:[#allocation8_spill]] %s2194_s29  ;;  %s45_s6 = sadd.s32 1, %s2206_s0 }
  0x1c   : > { %2762 = sst [smem:[#allocation9_spill]] %s2198_s30  ;;  %p46_p0 = scmp.ge.s32.totalorder %s45_s6, 2 }
  0x1d   : > { %2763 = sst [smem:[#allocation10_spill]] %s2202_s4  ;;  %s48_s25 = sadd.s32 1, %s2210_s23 }
  0x1e   : > { %2764 = sst [smem:[#allocation11_spill]] %s2206_s0  ;;  %p555_p1 = scmp.ne.s32.totalorder %s2194_s29, %s2190_s28 }
  0x1f   : > { %2765 = sst [smem:[#allocation12_spill]] %s2210_s23  ;;  %p556_p2 = scmp.eq.s32.totalorder %s1882_s5, 3 }
  0x20   : > { %2766 = sst [smem:[#allocation13_spill]] %s2214_s1  ;;  %s2824_s6 = smov (%p46_p0, %s45_s6), 0 }
  0x21   : > { %2767 = sst [smem:[#allocation14_spill]] %s2824_s6  ;;  %s2826_s25 = smov (!%p46_p0, %s48_s25), %s2210_s23 }
  0x22   : > { %p2393_p3 = por %p556_p2, %p555_p1  ;;  %p561_p4 = scmp.ne.s32.totalorder %s2190_s28, %s2186_s3 }
  0x23   : > { %p50_p5 = scmp.ge.s32.totalorder %s2826_s25, 2  ;;  %p562_p6 = scmp.eq.s32.totalorder %s1883_s24, 3 }
  0x24   : > { %s2768_s26 = scalar_select %p2393_p3, 1, 0 }
  0x25   : > { %p1886_p7 = scmp.ge.s32.totalorder %s2214_s1, 1  ;;  %p745_p8 = scmp.lt.s32.totalorder %s2214_s1, 5 }
  0x26   : > { %2769 = sst [smem:[#allocation15_spill]] %s2768_s26  ;;  %s2828_s25 = smov (%p50_p5, %s2826_s25), 0 }
  0x27   : > { %2770 = sst [smem:[#allocation16_spill]] %s2828_s25  ;;  %p2403_p9 = por %p562_p6, %p561_p4 }
  0x28   : > { %p746_p10 = pnand %p1886_p7, %p745_p8  ;;  %s542_s27 = ssub.s32 %s2210_s23, %s2828_s25 }
  0x29   : > { %s2771_s2 = scalar_select %p2403_p9, 1, 0 }
  0x2a   : > { %s545_s5 = sadd.s32 1, %s2194_s29  ;;  %p543_p11 = scmp.eq.s32.totalorder %s542_s27, 0 }
  0x2b   : > { %2772 = sst [smem:[#allocation17_spill]] %s2771_s2  ;;  %749 = sbr.rel (%p746_p10) target bundleno = 3066 (0xbfa), region = 100 }
  0x2c   : > { %s2411_s6 = scalar_select %p543_p11, %s2194_s29, %s545_s5  }
  0x2e   : > { %2773 = sst [smem:[#allocation18_spill]] %s2411_s6 }
  0x30   : > { %s2725_s24 = sand.u32 1, %s2190_s28   ;;  %p865_p12 = scmp.lt.s32.totalorder %s2202_s4, 1 }
  0x31   : > { %s2417_s0 = sshll.u32 %s2725_s24, 3  ;;  %p872_p13 = scmp.lt.s32.totalorder %s2198_s30, 1 }
  0x32   : > { %s2421_s2 = scalar_select %p865_p12, %s2202_s4, 1 }
  0x33   : > { %s2424_s27 = scalar_select %p872_p13, %s2198_s30, 1 }
  0x34   : > { %s1888_s5 = sshll.u32 %s2421_s2, 3  ;;  %s2775_s1 = sld [smem:[#allocation20_spill]] }
  0x35   : > { %s1976_s26 = sshll.u32 %s2424_s27, 4  ;;  %s2776_s19 = sld [smem:[#allocation24_spill]] }
  0x36   : > { %s2779_s24 = sld [smem:[#allocation26_spill]]  ;;  %s1979_s6 = sshll.u32 %s2424_s27, 5 }
  0x37   : > { %s2781_s10 = sld [smem:[#allocation28_spill]]  ;;  %s912_s16 = scalar_lea.vmem %s2713_s14, %s2424_s27 }
  0x38   : > { %s2783_s12 = sld [smem:[#allocation30_spill]]  ;;  %s1897_s22 = sshll.u32 %s2424_s27, 1 }
  0x39   : > { %s921_s25 = sadd.s32 %s1897_s22, %s2421_s2  ;;  %s2785_s9 = sld [smem:[#allocation38_spill]] }
  0x3a   : > { %s868_s20 = scalar_lea.vmem %s2775_s1, %s1888_s5  ;;  %s1898_s3 = sshll.u32 %s921_s25, 3 }
  0x3b   : > { %s2438_s17 = scalar_lea.vmem %s2776_s19, %s1976_s26  ;;  %s2787_s19 = sld [smem:[#allocation9_spill]] }
  0x3c   : > { %2777 = sst [smem:[#allocation19_spill]] %s2438_s17  ;;  %s2447_s23 = scalar_lea.vmem %s2779_s24, %s1976_s26 }
  0x3d   : > { %s2464_s30 = scalar_lea.vmem %s2781_s10, %s1976_s26  ;;  %s2784_s17 = sld [smem:[#allocation31_spill]] }
  0x3e   : > { %s2478_s28 = scalar_lea.vmem %s2783_s12, %s1979_s6  ;;  %s2786_s6 = sld [smem:[#allocation37_spill]] }
  0x3f   : > { %s2493_s29 = scalar_lea.vmem %s2785_s9, %s1888_s5  ;;  %s848_s12 = scalar_lea.vmem [#allocation3], %s2417_s0 }
  0x41   : > { %p1900_p0 = scmp.ne.s32.totalorder %s2787_s19, 0 }
  0x42   : > { %s2789_s5 = sld [smem:[#allocation23_spill]] (!%p1900_p0) }
  0x43   : > { %s915_s10 = scalar_lea.vmem %s2784_s17, %s2424_s27  ;;  %932 = sbr.rel (%p1900_p0) target bundleno = 343 (0x157), region = 104 }
  0x44   : > { %s2498_s1 = scalar_lea.vmem %s2786_s6, %s1898_s3  ;;  %s2788_s17 = sld [smem:[#allocation22_spill]] (!%p1900_p0) }
  0x48   : > { %v933_v0 = vld [vmem:[%s868_s20] sm:$0xff]  ;;  %vm936_vm0 = vcmask 261120   ;;  %v2216_v2 = vmov 32.0  }
  0x49   : > { %v937_v1 = vsel %vm936_vm0, %v933_v0, 0.0  ;;  %2081 = vrcp.f32 %v2216_v2  ;;  %v2080_v25 = vld [vmem:[%s2789_s5] ss:$0 sm:$0xff] }
  0x4a   : > { %938 = vadd.xlane.f32.xlu0 %v937_v1  ;;  %v2079_v23 = vld [vmem:[%s2788_s17] ss:$0 sm:$0xff] }
  0x4f   : > { %v2082_v3 = vpop.eup %2081 }
  0x50   : > { %v941_v4 = vmul.f32 32.0, %v2082_v3  ;;  %vm945_vm1 = vweird.f32 %v2082_v3 }
  0x52   : > { %v942_v5 = vsub.f32 1.0, %v941_v4 }
  0x54   : > { %v943_v6 = vmul.f32 %v2082_v3, %v942_v5 }
  0x56   : > { %v944_v7 = vadd.f32 %v2082_v3, %v943_v6 }
  0x58   : > { %v946_v8 = vsel %vm945_vm1, %v2082_v3, %v944_v7 }
  0xbd   : > { %v939_v9 = vpop.xlane.xlu0 %938 }
  0xbe   : > { %v947_v10 = vmul.f32 %v946_v8, %v939_v9 }
  0xc0   : > { %v948_v11 = vsub.f32 %v933_v0, %v947_v10 }
  0xc2   : > { %v949_v12 = vmul.f32 %v948_v11, %v948_v11 }
  0xc4   : > { %v950_v13 = vsel %vm936_vm0, %v949_v12, 0.0 }
  0xc5   : > { %951 = vadd.xlane.f32.xlu0 %v950_v13 }
 0x138   : > { %v952_v14 = vpop.xlane.xlu0 %951 }
 0x139   : > { %v953_v15 = vmul.f32 %v952_v14, %v946_v8 }
 0x13b   : > { %v954_v16 = vadd.f32 1e-12, %v953_v15 }
 0x13d   : > { %2083 = vrsqrt.f32 %v954_v16  ;;  %vm961_vm3 = vweird.f32 %v954_v16 }
 0x143   : > { %v2084_v17 = vpop.eup %2083 }
 0x144   : > { %v956_v18 = vmul.f32 %v2084_v17, %v954_v16  ;;  %vm962_vm2 = vweird.f32 %v2084_v17 }
 0x145   : > { %vm963_vm4 = vmor %vm961_vm3, %vm962_vm2 }
 0x146   : > { %v957_v19 = vmul.f32 %v2084_v17, %v956_v18 }
 0x148   : > { %v958_v20 = vmul.f32 0.5, %v957_v19 }
 0x14a   : > { %v959_v21 = vsub.f32 1.5, %v958_v20 }
 0x14c   : > { %v960_v22 = vmul.f32 %v2084_v17, %v959_v21 }
 0x14e   : > { %v964_v24 = vsel %vm963_vm4, %v2084_v17, %v960_v22 }
 0x14f   : > { %v965_v26 = vmul.f32 %v964_v24, %v948_v11 }
 0x151   : > { %v969_v27 = vmul.f32 %v2079_v23, %v965_v26 }
 0x153   : > { %v973_v28 = vadd.f32 %v2080_v25, %v969_v27 }
 0x155   : > { %974 = vst.msk [vmem:[#allocation2] sm:$0xff] %vm936_vm0, %v973_v28 }
 0x156   : > { %975 = vst.msk [vmem:[%s848_s12] sm:$0xff] %vm936_vm0, %v973_v28 }
 0x157 PF: > { %s2790_s24 = sld [smem:[#allocation19_spill]]  ;;  %vm998_vm5 = vcmask 261120   ;;  %s2217_s25 = smov 96   ;;  %vm1061_vm6 = vcmask 1043456   ;;  %vm1057_vm7 = vcmask 64512   ;;  %vm1298_vm8 = vcmask 130048  }
 0x158   : > { %s2791_s18 = sld [smem:[#allocation25_spill]]  ;;  %s2218_s3 = smov 64   ;;  %vm1300_vm9 = vcmask 195584   ;;  %vm1462_vm14 = vcmask 523264  }
 0x159   : > { %s2219_s15 = smov 120   ;;  %s2220_s6 = smov 104  }
 0x15a   : > { %s2793_s11 = sld [smem:[#allocation21_spill]]  ;;  %s2222_s20 = smov 56  }
 0x15b   : > { %s2223_s21 = smov 48   ;;  %s2224_s5 = smov 8  }
 0x15c   : > { %v2516_v31 = vld [vmem:[#allocation2] sm:$0xff]  ;;  %s2226_s4 = smov 16   ;;  %s2227_s26 = smov 24  }
 0x15d   : > { %v1981_v29 = vld [vmem:[%s2790_s24 + $0x8] sm:$0xff]  ;;  %v1980_v30 = vld [vmem:[%s2790_s24] sm:$0xff]  ;;  %v977_v32 = vpack.c.bf16 %v2516_v31, %v2516_v31  ;;  %s2225_s24 = smov 40   ;;  %s2797_s19 = sld [smem:[#allocation27_spill]] }
 0x15e   : > { %1008 = vmatpush.bf16.msra.mxu0 %v1981_v29  ;;  %s2792_s22 = scalar_lea.vmem %s2791_s18, %s2424_s27 }
 0x15f   : > { %v2085_v33 = vld [vmem:[%s2792_s22] ss:$0 sm:$0xff] }
 0x160   : > { %s2794_s17 = scalar_lea.vmem %s2793_s11, %s2421_s2  ;;  %s2221_s2 = smov 112  }
 0x161   : > { %v2544_v53 = vld [vmem:[%s2794_s17] ss:$0 sm:$0xff] }
 0x162   : > { %1009 = vmatpush.bf16.msra.mxu0 %v1980_v30 }
 0x163   : > { %s2798_s9 = scalar_lea.vmem %s2797_s19, %s2424_s27 }
 0x165   : > { %1909 = vmatmul.msk.bf16.vlgmr.msra.gmra.mxu0 %vm998_vm5, %v977_v32 }
 0x1e2   : > { %v1011_v34 = vpop.f32.mrf.mxu0 }
 0x1e3   : > { %v1012_v35 = vadd.f32 %v2085_v33, %v1011_v34 }
 0x1e5   : > { %v2526_v36 = vpack.c.bf16 %v1012_v35, %v1012_v35  ;;  %1016 = vrot.lane.b32.xlu0 %v1012_v35, %s2217_s25  ;;  %s2795_s25 = scalar_lea.vmem %s2706_s7, %s2424_s27 }
 0x1e7   : > { %1093 = vrot.lane.b32.xlu2 %v2526_v36, %s2218_s3  ;;  %s2796_s3 = scalar_lea.vmem %s2707_s8, %s2424_s27 }
 0x1ea   : > { %v1013_v37 = vpop.f32.mrf.mxu0 }
 0x1ef   : > { %1115 = vrot.lane.b32.xlu2 %v2526_v36, %s2219_s15 }
 0x1f7   : > { %1229 = vrot.lane.b32.xlu2 %v2526_v36, %s2220_s6 }
 0x241   : > { %v1094_v38 = vpop.permute.xlu2 %1093 }
 0x242   : > { %v1099_v39 = vsel %vm1061_vm6, %v1094_v38, 0 }
 0x243   : > { %1108 = vmatpush.bf16.msra.mxu2 %v1099_v39 }
 0x249   : > { %v1116_v47 = vpop.permute.xlu2 %1115 }
 0x251   : > { %v1230_v52 = vpop.permute.xlu2 %1229 }
 0x257   : > { %v1017_v40 = vpop.permute.xlu0 %1016 }
 0x258   : > { %1019 = vxpose.xlu0.b32.start.end [1/1] (short) (narrow) %v1017_v40, 32 }
 0x2fc   : > { %v1035_v41 = vpop.trf.xlu0 }
 0x2fd   : > { %v1056_v42 = vpack.c.bf16 %v1035_v41, %v1035_v41 }
 0x2ff   : > { %v1063_v43 = vsel %vm1061_vm6, %v1056_v42, 0 }
 0x300   : > { %1072 = vmatpush.bf16.msra.mxu1 %v1063_v43 }
 0x303   : > { %1910 = vmatmul.msk.bf16.vlgmr.msra.gmra.mxu1 %vm1057_vm7, %v2526_v36 }
 0x304   : > { %v1036_v44 = vpop.trf.xlu0 }
 0x305   : > { %v1114_v45 = vpack.c.bf16 %v1036_v44, %v1036_v44 }
 0x307   : > { %v1121_v46 = vsel %vm1061_vm6, %v1114_v45, 0 }
 0x308   : > { %1130 = vmatpush.bf16.msra.mxu3 %v1121_v46 }
 0x30b   : > { %1912 = vmatmul.msk.bf16.vlgmr.msra.gmra.mxu3 %vm1057_vm7, %v1116_v47 }
 0x30c   : > { %v1037_v48 = vpop.trf.xlu0 }
 0x30d   : > { %v1171_v15 = vpack.c.bf16 %v1037_v48, %v1037_v48 }
 0x30f   : > { %v1178_v16 = vsel %vm1061_vm6, %v1171_v15, 0  ;;  %v2228_v15 = vmov 32.0  }
 0x310   : > { %1187 = vmatpush.bf16.msrb.mxu2 %v1178_v16 }
 0x314   : > { %v1038_v49 = vpop.trf.xlu0 }
 0x315   : > { %v1228_v50 = vpack.c.bf16 %v1038_v49, %v1038_v49 }
 0x317   : > { %v1235_v51 = vsel %vm1061_vm6, %v1228_v50, 0 }
 0x318   : > { %1244 = vmatpush.bf16.msrb.mxu0 %v1235_v51 }
 0x31b   : > { %1916 = vmatmul.msk.bf16.vlgmr.msrb.gmra.mxu0 %vm1057_vm7, %v1230_v52 }
 0x380   : > { %v1074_v54 = vpop.f32.mrf.mxu1 }
 0x381   : > { %v1078_v55 = vmul.f32 0.35355338, %v1074_v54 }
 0x383   : > { %v1079_v56 = vadd.f32 %v2544_v53, %v1078_v55 }
 0x385   : > { %v1080_v57 = vsel %vm1057_vm7, %v1079_v56, -inf }
 0x386   : > { %1081 = vmax.xlane.f32.xlu1 %v1080_v57 }
 0x388   : > { %v1076_v58 = vpop.f32.mrf.mxu1 }
 0x38e   : > { %v1132_v59 = vpop.f32.mrf.mxu3 }
 0x38f   : > { %v1136_v60 = vmul.f32 0.35355338, %v1132_v59 }
 0x391   : > { %v1137_v61 = vadd.f32 %v2544_v53, %v1136_v60 }
 0x393   : > { %v1138_v62 = vsel %vm1057_vm7, %v1137_v61, -inf }
 0x394   : > { %1139 = vmax.xlane.f32.xlu2 %v1138_v62 }
 0x396   : > { %v1134_v63 = vpop.f32.mrf.mxu3 }
 0x398   : > { %v1246_v0 = vpop.f32.mrf.mxu0 }
 0x399   : > { %v1250_v1 = vmul.f32 0.35355338, %v1246_v0  ;;  %v1983_v0 = vld [vmem:[%s2447_s23 + $0x8] sm:$0xff] }
 0x39b   : > { %v1251_v2 = vadd.f32 %v2544_v53, %v1250_v1  ;;  %v1982_v1 = vld [vmem:[%s2447_s23] sm:$0xff] }
 0x39d   : > { %v1252_v3 = vsel %vm1057_vm7, %v1251_v2, -inf }
 0x39e   : > { %1253 = vmax.xlane.f32.xlu0 %v1252_v3 }
 0x3a0   : > { %v1248_v4 = vpop.f32.mrf.mxu0 }
 0x3f9   : > { %v1082_v5 = vpop.xlane.xlu1 %1081 }
 0x3fa   : > { %v1083_v6 = vsub.f32 %v1079_v56, %v1082_v5 }
 0x3fc   : > { %v1084_v7 = vmul.f32 1.442695, %v1083_v6 }
 0x3fe   : > { %2094 = vpow2.f32 %v1084_v7 }
 0x404   : > { %v2095_v8 = vpop.eup %2094 }
 0x405   : > { %v1086_v9 = vsel %vm1057_vm7, %v2095_v8, 0.0 }
 0x406   : > { %1087 = vadd.xlane.f32.xlu1 %v1086_v9  ;;  %v2087_v9 = vld [vmem:[%s2795_s25] ss:$0 sm:$0xff]  ;;  %s2803_s25 = sld [smem:[#allocation9_spill]] }
 0x407   : > { %v1140_v10 = vpop.xlane.xlu2 %1139 }
 0x408   : > { %v1141_v11 = vsub.f32 %v1137_v61, %v1140_v10 }
 0x40a   : > { %v1142_v12 = vmul.f32 1.442695, %v1141_v11 }
 0x40c   : > { %2096 = vpow2.f32 %v1142_v12  ;;  %p1953_p1 = scmp.ne.s32.totalorder %s2803_s25, 1 }
 0x40d   : > { %s2805_s6 = sld [smem:[#allocation34_spill]] (!%p1953_p1) }
 0x40e   : > { %s2806_s17 = sld [smem:[#allocation33_spill]] (!%p1953_p1) }
 0x411   : > { %v1254_v33 = vpop.xlane.xlu0 %1253 }
 0x412   : > { %v2097_v13 = vpop.eup %2096  ;;  %v1255_v35 = vsub.f32 %v1251_v2, %v1254_v33 }
 0x413   : > { %v1144_v14 = vsel %vm1057_vm7, %v2097_v13, 0.0 }
 0x414   : > { %1145 = vadd.xlane.f32.xlu2 %v1144_v14  ;;  %v1256_v37 = vmul.f32 1.442695, %v1255_v35 }
 0x41f   : > { %1172 = vrot.lane.b32.xlu1 %v2526_v36, %s2221_s2  ;;  %s2799_s2 = sld [smem:[#allocation29_spill]] }
 0x42c   : > { %1150 = vrot.lane.b32.xlu2 %v2526_v36, %s2222_s20  ;;  %s2800_s20 = scalar_lea.vmem %s2799_s2, %s2424_s27 }
 0x434   : > { %1207 = vrot.lane.b32.xlu2 %v2526_v36, %s2223_s21 }
 0x479   : > { %v1088_v17 = vpop.xlane.xlu1 %1087 }
 0x47a   : > { %2098 = vrcp.f32 %v1088_v17 }
 0x480   : > { %v2099_v18 = vpop.eup %2098 }
 0x481   : > { %v1090_v19 = vmul.f32 %v2099_v18, %v2095_v8 }
 0x483   : > { %v1091_v20 = vpack.c.bf16 %v1090_v19, %v1090_v19 }
 0x485   : > { %1911 = vmatmul.msk.bf16.vlgmr.msra.gmra.mxu2 %vm1057_vm7, %v1091_v20 }
 0x486   : > { %1332 = vmatpush.bf16.msra.mxu2 %v1983_v0 }
 0x487   : > { %v1146_v21 = vpop.xlane.xlu2 %1145 }
 0x488   : > { %2100 = vrcp.f32 %v1146_v21 }
 0x489   : > { %2102 = vpow2.f32 %v1256_v37 }
 0x48a   : > { %1333 = vmatpush.bf16.msra.mxu2 %v1982_v1 }
 0x48e   : > { %v2101_v22 = vpop.eup %2100 }
 0x48f   : > { %v1148_v23 = vmul.f32 %v2101_v22, %v2097_v13  ;;  %v1151_v24 = vpop.permute.xlu2 %1150  ;;  %v2103_v44 = vpop.eup %2102 }
 0x490   : > { %v1156_v25 = vsel %vm1061_vm6, %v1151_v24, 0  ;;  %v1258_v45 = vsel %vm1057_vm7, %v2103_v44, 0.0 }
 0x491   : > { %1165 = vmatpush.bf16.msrb.mxu1 %v1156_v25  ;;  %v1149_v26 = vpack.c.bf16 %v1148_v23, %v1148_v23  ;;  %v1173_v27 = vpop.permute.xlu1 %1172 }
 0x494   : > { %1913 = vmatmul.msk.bf16.vlgmr.msrb.gmra.mxu1 %vm1057_vm7, %v1149_v26  ;;  %v1985_v26 = vld [vmem:[%s2464_s30 + $0x8] sm:$0xff] }
 0x495   : > { %1914 = vmatmul.msk.bf16.vlgmr.msrb.gmra.mxu2 %vm1057_vm7, %v1173_v27  ;;  %v1984_v27 = vld [vmem:[%s2464_s30] sm:$0xff] }
 0x497   : > { %v1208_v28 = vpop.permute.xlu2 %1207 }
 0x498   : > { %v1213_v29 = vsel %vm1061_vm6, %v1208_v28, 0 }
 0x499   : > { %1222 = vmatpush.bf16.msrb.mxu3 %v1213_v29 }
 0x49d   : > { %1409 = vmatpush.bf16.msra.mxu3 %v1985_v26 }
 0x4a1   : > { %1410 = vmatpush.bf16.msra.mxu3 %v1984_v27 }
 0x508   : > { %v1110_v30 = vpop.f32.mrf.mxu2 }
 0x510   : > { %v1112_v32 = vpop.f32.mrf.mxu2 }
 0x511   : > { %v1167_v34 = vpop.f32.mrf.mxu1 }
 0x512   : > { %1286 = vrot.lane.b32.xlu2 %v1167_v34, %s2224_s5  ;;  %s2801_s5 = scalar_lea.vmem %s2712_s13, %s2424_s27 }
 0x518   : > { %v1189_v38 = vpop.f32.mrf.mxu2 }
 0x519   : > { %v1193_v39 = vmul.f32 0.35355338, %v1189_v38  ;;  %v1169_v40 = vpop.f32.mrf.mxu1 }
 0x51b   : > { %v1194_v41 = vadd.f32 %v2544_v53, %v1193_v39  ;;  %v2088_v39 = vld [vmem:[%s2796_s3] ss:$0 sm:$0xff] }
 0x51d   : > { %v1195_v42 = vsel %vm1057_vm7, %v1194_v41, -inf }
 0x51e   : > { %1196 = vmax.xlane.f32.xlu1 %v1195_v42 }
 0x520   : > { %v1191_v43 = vpop.f32.mrf.mxu2 }
 0x526   : > { %1259 = vadd.xlane.f32.xlu1 %v1258_v45 }
 0x56c   : > { %v1287_v2 = vpop.permute.xlu2 %1286 }
 0x56d   : > { %v1297_v4 = vsel %vm1057_vm7, %v1110_v30, %v1287_v2 }
 0x591   : > { %v1197_v46 = vpop.xlane.xlu1 %1196 }
 0x592   : > { %v1198_v47 = vsub.f32 %v1194_v41, %v1197_v46  ;;  %v2089_v41 = vld [vmem:[%s2798_s9] ss:$0 sm:$0xff]  ;;  %v1989_v46 = vld [vmem:[%s2478_s28 + $0x18] sm:$0xff] }
 0x593   : > { %1470 = vmatpush.bf16.msra.mxu0 %v1989_v46 }
 0x594   : > { %v1199_v48 = vmul.f32 1.442695, %v1198_v47  ;;  %v1988_v47 = vld [vmem:[%s2478_s28 + $0x10] sm:$0xff] }
 0x596   : > { %2104 = vpow2.f32 %v1199_v48  ;;  %v1987_v48 = vld [vmem:[%s2478_s28 + $0x8] sm:$0xff] }
 0x597   : > { %1471 = vmatpush.bf16.msra.mxu0 %v1988_v47 }
 0x599   : > { %v1260_v51 = vpop.xlane.xlu1 %1259 }
 0x59b   : > { %1472 = vmatpush.bf16.msra.mxu0 %v1987_v48 }
 0x59c   : > { %v2105_v49 = vpop.eup %2104 }
 0x59d   : > { %v1201_v50 = vsel %vm1057_vm7, %v2105_v49, 0.0 }
 0x59e   : > { %1202 = vadd.xlane.f32.xlu1 %v1201_v50  ;;  %v2090_v50 = vld [vmem:[%s2800_s20] ss:$0 sm:$0xff] }
 0x5b7   : > { %1264 = vrot.lane.b32.xlu1 %v2526_v36, %s2225_s24 }
 0x611   : > { %v1203_v52 = vpop.xlane.xlu1 %1202 }
 0x612   : > { %2106 = vrcp.f32 %v1203_v52 }
 0x613   : > { %2108 = vrcp.f32 %v1260_v51 }
 0x614   : > { %2110 = vrcp.f32 %v2228_v15 }
 0x618   : > { %v2107_v53 = vpop.eup %2106 }
 0x619   : > { %v1205_v54 = vmul.f32 %v2107_v53, %v2105_v49  ;;  %v2109_v56 = vpop.eup %2108  ;;  %v1986_v49 = vld [vmem:[%s2478_s28] sm:$0xff]  ;;  %s2807_s28 = sld [smem:[#allocation35_spill]] (!%p1953_p1) }
 0x61a   : > { %v1262_v57 = vmul.f32 %v2109_v56, %v2103_v44  ;;  %v2111_v16 = vpop.eup %2110  ;;  %1473 = vmatpush.bf16.msra.mxu0 %v1986_v49 }
 0x61b   : > { %v1206_v55 = vpack.c.bf16 %v1205_v54, %v1205_v54  ;;  %v1346_v17 = vmul.f32 32.0, %v2111_v16  ;;  %vm1350_vm10 = vweird.f32 %v2111_v16 }
 0x61c   : > { %v1263_v60 = vpack.c.bf16 %v1262_v57, %v1262_v57 }
 0x61d   : > { %1915 = vmatmul.msk.bf16.vlgmr.msrb.gmra.mxu3 %vm1057_vm7, %v1206_v55  ;;  %v1347_v18 = vsub.f32 1.0, %v1346_v17 }
 0x61f   : > { %v1348_v19 = vmul.f32 %v2111_v16, %v1347_v18 }
 0x621   : > { %v1349_v20 = vadd.f32 %v2111_v16, %v1348_v19  ;;  %v2092_v19 = vld [vmem:[%s912_s16] ss:$0 sm:$0xff]  ;;  %s2804_s16 = sld [smem:[#allocation32_spill]] (!%p1953_p1) }
 0x623   : > { %v2582_v21 = vsel %vm1350_vm10, %v2111_v16, %v1349_v20 }
 0x629   : > { %v1265_v58 = vpop.permute.xlu1 %1264 }
 0x62a   : > { %v1270_v59 = vsel %vm1061_vm6, %v1265_v58, 0 }
 0x62b   : > { %1279 = vmatpush.bf16.msra.mxu1 %v1270_v59 }
 0x62e   : > { %1917 = vmatmul.msk.bf16.vlgmr.msra.gmra.mxu1 %vm1057_vm7, %v1263_v60 }
 0x6a0   : > { %v1224_v36 = vpop.f32.mrf.mxu3 }
 0x6a1   : > { %1290 = vrot.lane.b32.xlu2 %v1224_v36, %s2226_s4 }
 0x6a8   : > { %v1226_v61 = vpop.f32.mrf.mxu3 }
 0x6ab   : > { %v1281_v62 = vpop.f32.mrf.mxu1 }
 0x6ac   : > { %1294 = vrot.lane.b32.xlu2 %v1281_v62, %s2227_s26 }
 0x6b3   : > { %v1283_v63 = vpop.f32.mrf.mxu1 }
 0x6b4   : > { %v2091_v63 = vld [vmem:[%s2801_s5] ss:$0 sm:$0xff] }
 0x6fb   : > { %v1291_v3 = vpop.permute.xlu2 %1290 }
 0x6fc   : > { %v1299_v5 = vsel %vm1298_vm8, %v1297_v4, %v1291_v3 }
 0x706   : > { %v1295_v6 = vpop.permute.xlu2 %1294 }
 0x707   : > { %v1301_v7 = vsel %vm1300_vm9, %v1299_v5, %v1295_v6 }
 0x708   : > { %v1302_v8 = vpack.c.bf16 %v1301_v7, %v1301_v7 }
 0x70a   : > { %1926 = vmatmul.msk.bf16.vlgmr.msra.gmra.mxu2 %vm998_vm5, %v1302_v8 }
 0x78d   : > { %v1335_v10 = vpop.f32.mrf.mxu2 }
 0x78e   : > { %v1336_v11 = vadd.f32 %v2087_v9, %v1335_v10 }
 0x790   : > { %v1339_v12 = vadd.f32 %v1336_v11, %v2516_v31 }
 0x792   : > { %v1342_v13 = vsel %vm998_vm5, %v1339_v12, 0.0 }
 0x793   : > { %1343 = vadd.xlane.f32.xlu1 %v1342_v13 }
 0x795   : > { %v1337_v14 = vpop.f32.mrf.mxu2 }
 0x806   : > { %v1344_v22 = vpop.xlane.xlu1 %1343 }
 0x807   : > { %v1352_v23 = vmul.f32 %v2582_v21, %v1344_v22 }
 0x809   : > { %v1353_v31 = vsub.f32 %v1339_v12, %v1352_v23 }
 0x80b   : > { %v1354_v24 = vmul.f32 %v1353_v31, %v1353_v31 }
 0x80d   : > { %v1355_v25 = vsel %vm998_vm5, %v1354_v24, 0.0 }
 0x80e   : > { %1356 = vadd.xlane.f32.xlu2 %v1355_v25 }
 0x881   : > { %v1357_v28 = vpop.xlane.xlu2 %1356 }
 0x882   : > { %v1358_v29 = vmul.f32 %v1357_v28, %v2582_v21 }
 0x884   : > { %v1359_v30 = vadd.f32 1e-12, %v1358_v29 }
 0x886   : > { %2112 = vrsqrt.f32 %v1359_v30  ;;  %vm1366_vm12 = vweird.f32 %v1359_v30 }
 0x88c   : > { %v2113_v32 = vpop.eup %2112 }
 0x88d   : > { %v1361_v33 = vmul.f32 %v2113_v32, %v1359_v30  ;;  %vm1367_vm11 = vweird.f32 %v2113_v32 }
 0x88e   : > { %vm1368_vm13 = vmor %vm1366_vm12, %vm1367_vm11 }
 0x88f   : > { %v1362_v34 = vmul.f32 %v2113_v32, %v1361_v33 }
 0x891   : > { %v1363_v35 = vmul.f32 0.5, %v1362_v34 }
 0x893   : > { %v1364_v37 = vsub.f32 1.5, %v1363_v35 }
 0x895   : > { %v1365_v38 = vmul.f32 %v2113_v32, %v1364_v37 }
 0x897   : > { %v1369_v40 = vsel %vm1368_vm13, %v2113_v32, %v1365_v38 }
 0x898   : > { %v1370_v42 = vmul.f32 %v1369_v40, %v1353_v31 }
 0x89a   : > { %v1374_v43 = vmul.f32 %v2088_v39, %v1370_v42 }
 0x89c   : > { %v1378_v44 = vadd.f32 %v2089_v41, %v1374_v43 }
 0x89e   : > { %v1379_v45 = vpack.c.bf16 %v1378_v44, %v1378_v44 }
 0x8a0   : > { %1935 = vmatmul.msk.bf16.vlgmr.msra.gmra.mxu3 %vm998_vm5, %v1379_v45 }
 0x923   : > { %v1412_v51 = vpop.f32.mrf.mxu3 }
 0x924   : > { %v1413_v52 = vadd.f32 %v2090_v50, %v1412_v51 }
 0x926   : > { %v1417_v53 = vmul.f32 0.044715, %v1413_v52  ;;  %v1416_v60 = vmul.f32 0.5, %v1413_v52 }
 0x928   : > { %v1418_v54 = vmul.f32 %v1417_v53, %v1413_v52 }
 0x92a   : > { %v1419_v55 = vmul.f32 %v1418_v54, %v1413_v52 }
 0x92b   : > { %v1414_v56 = vpop.f32.mrf.mxu3 }
 0x92c   : > { %v1420_v57 = vadd.f32 %v1419_v55, %v1413_v52 }
 0x92e   : > { %v1421_v58 = vmul.f32 0.7978846, %v1420_v57 }
 0x930   : > { %2114 = vtanh.f32 %v1421_v58 }
 0x936   : > { %v2115_v59 = vpop.eup %2114 }
 0x937   : > { %v1423_v36 = vadd.f32 1.0, %v2115_v59 }
 0x939   : > { %v1424_v61 = vmul.f32 %v1423_v36, %v1416_v60 }
 0x93b   : > { %v1425_v62 = vpack.c.bf16 %v1424_v61, %v1424_v61 }
 0x93d   : > { %1952 = vmatmul.msk.bf16.vlgmr.msra.gmra.mxu0 %vm1462_vm14, %v1425_v62 }
 0x9ba   : > { %v1475_v0 = vpop.f32.mrf.mxu0 }
 0x9bb   : > { %v1476_v1 = vadd.f32 %v2091_v63, %v1475_v0 }
 0x9bd   : > { %v1479_v2 = vadd.f32 %v1476_v1, %v1378_v44 }
 0x9bf   : > { %v1482_v3 = vsel %vm998_vm5, %v1479_v2, 0.0 }
 0x9c0   : > { %1483 = vadd.xlane.f32.xlu1 %v1482_v3 }
 0x9c2   : > { %v1477_v4 = vpop.f32.mrf.mxu0 }
 0xa33   : > { %v1484_v5 = vpop.xlane.xlu1 %1483 }
 0xa34   : > { %v1485_v6 = vmul.f32 %v1484_v5, %v2582_v21 }
 0xa36   : > { %v1486_v7 = vsub.f32 %v1479_v2, %v1485_v6 }
 0xa38   : > { %v1487_v8 = vmul.f32 %v1486_v7, %v1486_v7 }
 0xa3a   : > { %v1488_v9 = vsel %vm998_vm5, %v1487_v8, 0.0 }
 0xa3b   : > { %1489 = vadd.xlane.f32.xlu2 %v1488_v9 }
 0xaae   : > { %v1490_v10 = vpop.xlane.xlu2 %1489 }
 0xaaf   : > { %v1491_v11 = vmul.f32 %v1490_v10, %v2582_v21  ;;  %v2093_v21 = vld [vmem:[%s915_s10] ss:$0 sm:$0xff] }
 0xab1   : > { %v1492_v12 = vadd.f32 1e-12, %v1491_v11 }
 0xab3   : > { %2116 = vrsqrt.f32 %v1492_v12  ;;  %vm1499_vm0 = vweird.f32 %v1492_v12 }
 0xab9   : > { %v2117_v13 = vpop.eup %2116 }
 0xaba   : > { %v1494_v14 = vmul.f32 %v2117_v13, %v1492_v12  ;;  %vm1500_vm15 = vweird.f32 %v2117_v13 }
 0xabb   : > { %vm1501_vm1 = vmor %vm1499_vm0, %vm1500_vm15 }
 0xabc   : > { %v1495_v15 = vmul.f32 %v2117_v13, %v1494_v14 }
 0xabe   : > { %v1496_v16 = vmul.f32 0.5, %v1495_v15 }
 0xac0   : > { %v1497_v17 = vsub.f32 1.5, %v1496_v16 }
 0xac2   : > { %v1498_v18 = vmul.f32 %v2117_v13, %v1497_v17 }
 0xac4   : > { %v1502_v20 = vsel %vm1501_vm1, %v2117_v13, %v1498_v18 }
 0xac5   : > { %v1503_v22 = vmul.f32 %v1502_v20, %v1486_v7 }
 0xac7   : > { %v1507_v23 = vmul.f32 %v2092_v19, %v1503_v22 }
 0xac8   : > { %1517 = sbr.rel (%p1953_p1) target bundleno = 3044 (0xbe4), region = 108 }
 0xac9   : > { %v1511_v31 = vadd.f32 %v2093_v21, %v1507_v23 }
 0xacb   : > { %1512 = vst.msk [vmem:[#allocation2] sm:$0xff] %vm998_vm5, %v1511_v31 }
 0xacc   : > { %1513 = vst.msk [vmem:[%s2498_s1] sm:$0xff] %vm998_vm5, %v1511_v31 }
 0xacd   : > { %v1991_v24 = vld [vmem:[%s2804_s16 + $0x8] sm:$0xff]  ;;  %v1990_v25 = vld [vmem:[%s2804_s16] sm:$0xff]  ;;  %v1518_v26 = vpack.c.bf16 %v1511_v31, %v1511_v31 }
 0xace   : > { %1545 = vmatpush.bf16.msra.mxu0 %v1991_v24  ;;  %v1993_v27 = vld [vmem:[%s2805_s6 + $0x8] sm:$0xff]  ;;  %v1992_v28 = vld [vmem:[%s2805_s6] sm:$0xff] }
 0xacf   : > { %1580 = vmatpush.bf16.msra.mxu1 %v1993_v27  ;;  %v1523_v29 = vld [vmem:[%s2806_s17] sm:$0x1] }
 0xad0   : > { %v1558_v37 = vld [vmem:[%s2807_s28] sm:$0x1] }
 0xad2   : > { %1546 = vmatpush.bf16.msra.mxu0 %v1990_v25 }
 0xad3   : > { %1581 = vmatpush.bf16.msra.mxu1 %v1992_v28 }
 0xad5   : > { %1962 = vmatmul.msk.bf16.vlgmr.msra.gmra.mxu0 %vm998_vm5, %v1518_v26 }
 0xb52   : > { %v1548_v30 = vpop.f32.mrf.mxu0 }
 0xb53   : > { %v1549_v32 = vadd.f32 %v1548_v30, %v1523_v29 }
 0xb55   : > { %2118 = vtanh.f32 %v1549_v32 }
 0xb5a   : > { %v1550_v33 = vpop.f32.mrf.mxu0 }
 0xb5b   : > { %v2119_v34 = vpop.eup %2118 }
 0xb5c   : > { %v1553_v35 = vpack.c.bf16 %v2119_v34, %v2119_v34 }
 0xb5e   : > { %1971 = vmatmul.msk.bf16.vlgmr.msra.gmra.mxu1 %vm998_vm5, %v1553_v35 }
 0xbdb   : > { %v1583_v38 = vpop.f32.mrf.mxu1 }
 0xbdc   : > { %v1584_v39 = vadd.f32 %v1583_v38, %v1558_v37 }
 0xbde   : > { %v1587_v40 = vperm.slane %v1584_v39, 0 }
 0xbe0   : > { %1588 = vst [vmem:[%s2493_s29] sm:$0xff] %v1587_v40 }
 0xbe3   : > { %v1585_v41 = vpop.f32.mrf.mxu1 }
 0xbe4 PF: > { %s2808_s21 = sld [smem:[#allocation10_spill]]  ;;  %s1614_s23 = sshll.u32 %s848_s12, 4  ;;  %s1615_s23 = int_to_ptr.vmem [resolvable:$true] %s1614_s23 }
 0xbe5   : > { %s2809_s5 = sld [smem:[#allocation7_spill]] }
 0xbe6   : > { %s2811_s22 = sld [smem:[#allocation36_spill]] }
 0xbea   : > { %s1973_s4 = sshll.u32 %s2808_s21, 3 }
 0xbeb   : > { %s2812_s3 = sand.u32 1, %s2809_s5  }
 0xbec   : > { %s1612_s25 = scalar_lea.hbm %s2811_s22, %s1973_s4  ;;  %s1590_s15 = scalar_lea.sflag [#allocation4], %s2812_s3 }
 0xbed   : > { %s1616_s30 = sshll.u32 %s1612_s25, 4  ;;  %s2140_s19 = scalar_lea.hbm %s2811_s22, 16  ;;  %s1617_s30 = int_to_ptr.hbm [resolvable:$true] %s1616_s30 }
 0xbee   : > { %s2134_s10 = sshra.s32 %s1617_s30, 4  ;;  %s2135_s10 = int_to_ptr.hbm [resolvable:$true] %s2134_s10 }
 0xbef   : > { %s2136_s29 = scalar_lea.hbm %s2135_s10, 8  ;;  %p2141_p6 = scmp.lt.s32.totalorder %s2135_s10, %s2811_s22 }
 0xbf0   : > { %p2137_p2 = scmp.ne.s32.totalorder %s2135_s10, %s2136_s29  ;;  %p2142_p7 = scmp.lt.s32.totalorder %s2140_s19, %s2136_s29 }
 0xbf2   : > { %p2138_p4 = pnand %p2137_p2, %p2393_p3  ;;  %p2143_p8 = por %p2142_p7, %p2141_p6 }
 0xbf4   : > { %p2139_p5 = pneg %p2138_p4 }
 0xbf6   : > { %p2144_p10 = pnand %p2143_p8, %p2139_p5 }
 0xbf8   : > { %2147 = shalt.err (!%p2144_p10)
}
 0xbf9   : > { %1994 = dma.vmem_to_hbm [thread:$0]  (%p2393_p3), %s1615_s23, 128, %s1617_s30, %s1590_s15  }
 0xbfa PF: > { %s2813_s12 = sld [smem:[#allocation13_spill]] }
 0xbfb   : > { %s2814_s0 = sld [smem:[#allocation6_spill]] }
 0xc00   : > { %p2000_p11 = scmp.ge.s32.totalorder %s2813_s12, 2 }
 0xc01   : > { %s1634_s2 = sand.u32 1, %s2814_s0  }
 0xc02   : > { %p1997_p12 = pnand %p2000_p11, %p2403_p9  ;;  %s1635_s20 = scalar_lea.sflag [#allocation4], %s1634_s2 }
 0xc04   : > { %p1998_p13 = pneg %p1997_p12 }
 0xc06   : > { %2181 = dma.done.wait (%p1998_p13), %s1635_s20, 128  }
 0xc07   : > { %2183 = vsyncadd (%p1998_p13), %s1635_s20, 4294967168  ;;  %s36_s1 = sadd.s32 1, %s2813_s12   ;;  %s2816_s3 = sld [smem:[#allocation7_spill]] }
 0xc08   : > { %p33_p0 = scmp.ge.s32.totalorder %s36_s1, 6   ;;  %s2817_s28 = sld [smem:[#allocation8_spill]] }
 0xc09   : > { %s2818_s29 = sld [smem:[#allocation18_spill]] }
 0xc0a   : > { %s2819_s30 = sld [smem:[#allocation11_spill]]  ;;  %35 = sbr.rel (!%p33_p0) target bundleno = 25 (0x19), region = 206 }
 0xc0b   : > { %s2820_s4 = sld [smem:[#allocation12_spill]] }
 0xc0c   : > { %s2821_s0 = sld [smem:[#allocation14_spill]] }
 0xc0d   : > { %s2822_s23 = sld [smem:[#allocation16_spill]] }
 0xc0f   :  { %1659 = vsyncpa [#allocation4], 1 }
 0xc10   :  { %1661 = vsyncpa [#allocation4 + $0x1], 1 }

</bundles_post_ra>
